<compile_context>
chip_gen: v6e
topology: v6e:2x2x1
jax: 0.10.0
libtpu: 0.0.40
codegen_flags: <defaults>
</compile_context>

<pallas_src>
import math

import jax
import jax.numpy as jnp
from jax.experimental import pallas as pl
from jax.experimental.pallas import tpu as pltpu

EMB = 64
NUM_HEADS = 4
LN_EPS = 1e-5        # nn.LayerNorm default eps
COUNT_EPS = 1e-8     # matches "+ 1e-08" in the reference forward
NEG_INF = -1e30      # key bias for padded classes


def anchor3_branch_kernel(x_ref, sem_ref, clsc_ref, clsr_ref, kb_ref,
                          w2_ref, wqkv_ref, wo_ref, b2_ref, bqkv_ref,
                          out_ref):
    _, N, E = x_ref.shape
    _, L, _ = sem_ref.shape
    H = NUM_HEADS
    hd = E // H

    x = x_ref[0]                 # (N, E)
    sem = sem_ref[0]             # (L, E)
    cls_col = clsc_ref[0]        # (N, 1) int32, -1 marks padded nodes
    cls_row = clsr_ref[0]        # (1, N) int32
    kbias = kb_ref[0]            # (1, 1, L)  0 for real classes, -1e30 for pad

    # pre-transposed 2-D weights, layout (in, out): no in-kernel transposes
    w_send = w2_ref[0, 0]        # (E, E)
    w_rec1 = w2_ref[0, 1]        # (E, E)  acts on x_s
    w_rec2 = w2_ref[0, 2]        # (E, E)  acts on layer-normed updates
    b2 = b2_ref[0]               # (5, E): send_b, o_b, ln_g, ln_b, rec_b
    b_send = b2[0:1, :]
    b_o = b2[1:2, :]
    ln_g = b2[2:3, :]
    ln_b = b2[3:4, :]
    b_rec = b2[4:5, :]

    # head-major attention projection weights / biases (scale folded into q)
    wq = wqkv_ref[0, 0:H]            # (H, E, hd)
    wk = wqkv_ref[0, H:2 * H]        # (H, E, hd)
    wv = wqkv_ref[0, 2 * H:3 * H]    # (H, E, hd)
    bq = bqkv_ref[0, 0:H]            # (H, 1, hd)
    bk = bqkv_ref[0, H:2 * H]
    bv = bqkv_ref[0, 2 * H:3 * H]
    wo = wo_ref[0]                   # (H, hd, E)

    # ---- send linear ------------------------------------------------------
    x_s = jnp.dot(x, w_send, preferred_element_type=jnp.float32) + b_send

    # ---- per-class mean pool (both mask orientations built directly) ------
    iota_nl = jax.lax.broadcasted_iota(jnp.int32, (N, L), 1)
    mask = (cls_col == iota_nl).astype(jnp.float32)               # (N, L) scatter
    iota_ln = jax.lax.broadcasted_iota(jnp.int32, (L, N), 0)
    mask_t = (cls_row == iota_ln).astype(jnp.float32)             # (L, N) pool
    counts = jnp.sum(mask_t, axis=1, keepdims=True)               # (L, 1)
    inv_counts = pl.reciprocal(counts + COUNT_EPS, approx=True)
    agg = jnp.dot(mask_t, x_s,
                  preferred_element_type=jnp.float32) * inv_counts  # (L, E)

    # ---- 4-head cross attention (query = class semantics, kv = agg) -------
    sem_b = jnp.broadcast_to(sem, (H, L, E))
    agg_b = jnp.broadcast_to(agg, (H, L, E))
    qh = jnp.einsum('hle,hed->hld', sem_b, wq,
                    preferred_element_type=jnp.float32) + bq        # (H, L, hd)
    kh = jnp.einsum('hle,hed->hld', agg_b, wk,
                    preferred_element_type=jnp.float32) + bk
    vh = jnp.einsum('hle,hed->hld', agg_b, wv,
                    preferred_element_type=jnp.float32) + bv
    s = jnp.einsum('hqd,hkd->hqk', qh, kh,
                   preferred_element_type=jnp.float32) + kbias      # (H, L, L)
    s = s - jnp.max(s, axis=-1, keepdims=True)
    p = jnp.exp(s)
    p = p * pl.reciprocal(jnp.sum(p, axis=-1, keepdims=True), approx=True)
    o = jnp.einsum('hqk,hkd->hqd', p, vh,
                   preferred_element_type=jnp.float32)              # (H, L, hd)
    z = jnp.einsum('hqd,hde->hqe', o, wo,
                   preferred_element_type=jnp.float32)              # (H, L, E)
    final = jnp.sum(z, axis=0) + b_o                                # (L, E)

    # ---- scatter per-class result back to nodes + LayerNorm ---------------
    updates = jnp.dot(mask, final, preferred_element_type=jnp.float32)  # (N, E)
    mu = jnp.mean(updates, axis=-1, keepdims=True)
    var = jnp.mean((updates - mu) ** 2, axis=-1, keepdims=True)
    ln_u = (updates - mu) * jax.lax.rsqrt(var + LN_EPS) * ln_g + ln_b

    # ---- rec linear on concat([x_s, ln_u]) ---------------------------------
    out = (jnp.dot(x_s, w_rec1, preferred_element_type=jnp.float32)
           + jnp.dot(ln_u, w_rec2, preferred_element_type=jnp.float32)
           + b_rec)
    out_ref[0] = out.astype(out_ref.dtype)


def _pack_branch(send_w, send_b, att, ln_g, ln_b, rec_w, rec_b, emb):
    """Pre-transpose & stack one branch's parameters (host side, free)."""
    h, hd = NUM_HEADS, emb // NUM_HEADS
    scale = 1.0 / math.sqrt(hd)

    def to_heads(w_t):                              # (E_in, E_out) -> (H, E_in, hd)
        return jnp.transpose(w_t.reshape(emb, h, hd), (1, 0, 2))

    w2 = jnp.stack([send_w.T, rec_w[:, :emb].T, rec_w[:, emb:].T])      # (3, E, E)
    wqkv = jnp.concatenate([to_heads(att['q_w'].T * scale),
                            to_heads(att['k_w'].T),
                            to_heads(att['v_w'].T)], axis=0)            # (3H, E, hd)
    wo = att['o_w'].T.reshape(h, hd, emb)                               # (H, hd, E)
    b2 = jnp.stack([send_b.reshape(emb), att['o_b'].reshape(emb),
                    ln_g.reshape(emb), ln_b.reshape(emb),
                    rec_b.reshape(emb)])                                # (5, E)
    bqkv = jnp.concatenate([(att['q_b'] * scale).reshape(h, 1, hd),
                            att['k_b'].reshape(h, 1, hd),
                            att['v_b'].reshape(h, 1, hd)], axis=0)      # (3H, 1, hd)
    return w2, wqkv, wo, b2, bqkv


@jax.jit
def anchor3_forward(v, c, v_sem, c_sem, v_class, c_class, params):
    E = v.shape[1]
    H, hd = NUM_HEADS, E // NUM_HEADS
    N_v, N_c = v.shape[0], c.shape[0]
    L_v, L_c = v_sem.shape[0], c_sem.shape[0]
    N = max(N_v, N_c)
    L = max(L_v, L_c)

    def pad_rows(a, n):
        return jnp.pad(a, ((0, n - a.shape[0]), (0, 0)))

    def pad_cls(cl, n):
        return jnp.pad(cl.astype(jnp.int32), (0, n - cl.shape[0]),
                       constant_values=-1)

    def key_bias(l_act):
        return jnp.where(jnp.arange(L) < l_act, 0.0, NEG_INF).astype(jnp.float32)

    x = jnp.stack([pad_rows(v, N), pad_rows(c, N)])                    # (2, N, E)
    sem = jnp.stack([pad_rows(v_sem, L), pad_rows(c_sem, L)])          # (2, L, E)
    cls = jnp.stack([pad_cls(v_class, N), pad_cls(c_class, N)])        # (2, N)
    cls_col = cls.reshape(2, N, 1)
    cls_row = cls.reshape(2, 1, N)
    kb = jnp.stack([key_bias(L_v), key_bias(L_c)]).reshape(2, 1, 1, L)

    pv = _pack_branch(params['send_var_w'], params['send_var_b'],
                      params['att_var'], params['ln_g'], params['ln_b'],
                      params['rec_var_w'], params['rec_var_b'], E)
    pc = _pack_branch(params['send_con_w'], params['send_con_b'],
                      params['att_con'], params['ln_g'], params['ln_b'],
                      params['rec_con_w'], params['rec_con_b'], E)
    w2, wqkv, wo, b2, bqkv = (jnp.stack([a, b]) for a, b in zip(pv, pc))

    in_specs = [
        pl.BlockSpec((1, N, E), lambda b: (b, 0, 0)),            # x
        pl.BlockSpec((1, L, E), lambda b: (b, 0, 0)),            # sem
        pl.BlockSpec((1, N, 1), lambda b: (b, 0, 0)),            # cls_col
        pl.BlockSpec((1, 1, N), lambda b: (b, 0, 0)),            # cls_row
        pl.BlockSpec((1, 1, 1, L), lambda b: (b, 0, 0, 0)),      # key bias
        pl.BlockSpec((1, 3, E, E), lambda b: (b, 0, 0, 0)),      # w2
        pl.BlockSpec((1, 3 * H, E, hd), lambda b: (b, 0, 0, 0)),  # wqkv
        pl.BlockSpec((1, H, hd, E), lambda b: (b, 0, 0, 0)),     # wo
        pl.BlockSpec((1, 5, E), lambda b: (b, 0, 0)),            # b2
        pl.BlockSpec((1, 3 * H, 1, hd), lambda b: (b, 0, 0, 0)),  # bqkv
    ]
    out = pl.pallas_call(
        anchor3_branch_kernel,
        out_shape=jax.ShapeDtypeStruct((2, N, E), jnp.float32),
        grid=(2,),
        in_specs=in_specs,
        out_specs=pl.BlockSpec((1, N, E), lambda b: (b, 0, 0)),
        compiler_params=pltpu.CompilerParams(
            dimension_semantics=("parallel",)),
    )(x, sem, cls_col, cls_row, kb, w2, wqkv, wo, b2, bqkv)

    return out[0, :N_v], out[1, :N_c]


# ----------------------- pure-JAX reference (for checking) -----------------------
def ref_branch(x, sem, cls, send_w, send_b, att, ln_g, ln_b, rec_w, rec_b):
    E = x.shape[1]
    L = sem.shape[0]
    hd = E // NUM_HEADS
    x_s = x @ send_w.T + send_b
    mask = (cls[:, None] == jnp.arange(L)[None, :]).astype(jnp.float32)
    counts = mask.sum(0, keepdims=True) + COUNT_EPS
    agg = (mask.T @ x_s) / counts.T
    q = sem @ att['q_w'].T + att['q_b']
    k = agg @ att['k_w'].T + att['k_b']
    v = agg @ att['v_w'].T + att['v_b']
    qh = q.reshape(L, NUM_HEADS, hd).transpose(1, 0, 2)
    kh = k.reshape(L, NUM_HEADS, hd).transpose(1, 0, 2)
    vh = v.reshape(L, NUM_HEADS, hd).transpose(1, 0, 2)
    s = jnp.einsum('hqd,hkd->hqk', qh, kh) / math.sqrt(hd)
    p = jax.nn.softmax(s, axis=-1)
    o = jnp.einsum('hqk,hkd->hqd', p, vh).transpose(1, 0, 2).reshape(L, E)
    final = o @ att['o_w'].T + att['o_b']
    updates = mask @ final
    mu = updates.mean(-1, keepdims=True)
    var = ((updates - mu) ** 2).mean(-1, keepdims=True)
    ln_u = (updates - mu) / jnp.sqrt(var + LN_EPS) * ln_g + ln_b
    return jnp.concatenate([x_s, ln_u], axis=-1) @ rec_w.T + rec_b


# ----------------------- deterministic parameter init -----------------------
def init_params(key, emb):
    ks = jax.random.split(key, 32)
    it = iter(ks)
    w = lambda shape, s=0.1: jax.random.normal(next(it), shape, jnp.float32) * s

    def att_params():
        return {
            'q_w': w((emb, emb)), 'k_w': w((emb, emb)), 'v_w': w((emb, emb)),
            'q_b': w((1, emb)),   'k_b': w((1, emb)),   'v_b': w((1, emb)),
            'o_w': w((emb, emb)), 'o_b': w((1, emb)),
        }

    return {
        'send_var_w': w((emb, emb)), 'send_var_b': w((1, emb)),
        'send_con_w': w((emb, emb)), 'send_con_b': w((1, emb)),
        'att_var': att_params(),
        'att_con': att_params(),
        'ln_g': 1.0 + w((1, emb)), 'ln_b': w((1, emb)),   # shared LayerNorm
        'rec_var_w': w((emb, 2 * emb)), 'rec_var_b': w((1, emb)),
        'rec_con_w': w((emb, 2 * emb)), 'rec_con_b': w((1, emb)),
    }


if __name__ == "__main__":
    emb = EMB
    v_n, c_n = 8, 6        # number of variable / constraint classes (unequal)
    N_v, N_c = 16, 12      # number of variable / constraint nodes (unequal)

    key = jax.random.PRNGKey(0)
    k = jax.random.split(key, 8)
    v = jax.random.normal(k[0], (N_v, emb), jnp.float32)
    c = jax.random.normal(k[1], (N_c, emb), jnp.float32)
    v_sem = jax.random.normal(k[2], (v_n, emb), jnp.float32)
    c_sem = jax.random.normal(k[3], (c_n, emb), jnp.float32)
    v_class = jax.random.randint(k[4], (N_v,), 0, v_n, jnp.int32)
    c_class = jax.random.randint(k[5], (N_c,), 0, c_n, jnp.int32)
    params = init_params(k[6], emb)

    v_out, c_out = anchor3_forward(v, c, v_sem, c_sem, v_class, c_class, params)
    jax.block_until_ready((v_out, c_out))

    v_ref = ref_branch(v, v_sem, v_class,
                       params['send_var_w'], params['send_var_b'],
                       params['att_var'], params['ln_g'], params['ln_b'],
                       params['rec_var_w'], params['rec_var_b'])
    c_ref = ref_branch(c, c_sem, c_class,
                       params['send_con_w'], params['send_con_b'],
                       params['att_con'], params['ln_g'], params['ln_b'],
                       params['rec_con_w'], params['rec_con_b'])

    assert v_out.shape == (N_v, emb) and c_out.shape == (N_c, emb)
    assert jnp.all(jnp.isfinite(v_out)) and jnp.all(jnp.isfinite(c_out))
    assert jnp.allclose(v_out, v_ref, rtol=1e-2, atol=1e-2)
    assert jnp.allclose(c_out, c_ref, rtol=1e-2, atol=1e-2)
    print("KERNEL_OK")
</pallas_src>

<mosaic_0001>
module attributes {stable_mosaic.version = 11 : i64} {
  func.func @anchor3_branch_kernel(%arg0: i32, %arg1: memref<1x16x64xf32, #tpu.memory_space<vmem>>, %arg2: memref<1x8x64xf32, #tpu.memory_space<vmem>>, %arg3: memref<1x16x1xi32, #tpu.memory_space<vmem>>, %arg4: memref<1x1x16xi32, #tpu.memory_space<vmem>>, %arg5: memref<1x1x1x8xf32, #tpu.memory_space<vmem>>, %arg6: memref<1x3x64x64xf32, #tpu.memory_space<vmem>>, %arg7: memref<1x12x64x16xf32, #tpu.memory_space<vmem>>, %arg8: memref<1x4x16x64xf32, #tpu.memory_space<vmem>>, %arg9: memref<1x5x64xf32, #tpu.memory_space<vmem>>, %arg10: memref<1x12x1x16xf32, #tpu.memory_space<vmem>>, %arg11: memref<1x16x64xf32, #tpu.memory_space<vmem>>) attributes {dimension_semantics = [#tpu.dimension_semantics<parallel>], iteration_bounds = array<i64: 2>, scalar_prefetch = 0 : i64, scratch_operands = 0 : i64, tpu.core_type = #tpu.core_type<tc>, window_params = [{transform_indices = @transform_0, window_bounds = array<i64: 1, 16, 64>}, {transform_indices = @transform_1, window_bounds = array<i64: 1, 8, 64>}, {transform_indices = @transform_2, window_bounds = array<i64: 1, 16, 1>}, {transform_indices = @transform_3, window_bounds = array<i64: 1, 1, 16>}, {transform_indices = @transform_4, window_bounds = array<i64: 1, 1, 1, 8>}, {transform_indices = @transform_5, window_bounds = array<i64: 1, 3, 64, 64>}, {transform_indices = @transform_6, window_bounds = array<i64: 1, 12, 64, 16>}, {transform_indices = @transform_7, window_bounds = array<i64: 1, 4, 16, 64>}, {transform_indices = @transform_8, window_bounds = array<i64: 1, 5, 64>}, {transform_indices = @transform_9, window_bounds = array<i64: 1, 12, 1, 16>}, {transform_indices = @transform_10, window_bounds = array<i64: 1, 16, 64>}]} {
    %c0 = arith.constant 0 : index
    %c0_0 = arith.constant 0 : index
    %c0_1 = arith.constant 0 : index
    %0 = vector.load %arg1[%c0, %c0_0, %c0_1] : memref<1x16x64xf32, #tpu.memory_space<vmem>>, vector<1x16x64xf32>
    %1 = vector.shape_cast %0 : vector<1x16x64xf32> to vector<16x64xf32>
    %c0_2 = arith.constant 0 : index
    %c0_3 = arith.constant 0 : index
    %c0_4 = arith.constant 0 : index
    %2 = vector.load %arg2[%c0_2, %c0_3, %c0_4] : memref<1x8x64xf32, #tpu.memory_space<vmem>>, vector<1x8x64xf32>
    %3 = vector.shape_cast %2 : vector<1x8x64xf32> to vector<8x64xf32>
    %c0_5 = arith.constant 0 : index
    %c0_6 = arith.constant 0 : index
    %c0_7 = arith.constant 0 : index
    %4 = vector.load %arg3[%c0_5, %c0_6, %c0_7] : memref<1x16x1xi32, #tpu.memory_space<vmem>>, vector<1x16x1xi32>
    %5 = vector.shape_cast %4 : vector<1x16x1xi32> to vector<16x1xi32>
    %c0_8 = arith.constant 0 : index
    %c0_9 = arith.constant 0 : index
    %c0_10 = arith.constant 0 : index
    %6 = vector.load %arg4[%c0_8, %c0_9, %c0_10] : memref<1x1x16xi32, #tpu.memory_space<vmem>>, vector<1x1x16xi32>
    %7 = vector.shape_cast %6 : vector<1x1x16xi32> to vector<1x16xi32>
    %c0_11 = arith.constant 0 : index
    %c0_12 = arith.constant 0 : index
    %c0_13 = arith.constant 0 : index
    %c0_14 = arith.constant 0 : index
    %8 = vector.load %arg5[%c0_11, %c0_12, %c0_13, %c0_14] : memref<1x1x1x8xf32, #tpu.memory_space<vmem>>, vector<1x1x1x8xf32>
    %9 = vector.shape_cast %8 : vector<1x1x1x8xf32> to vector<1x1x8xf32>
    %c0_15 = arith.constant 0 : index
    %c0_16 = arith.constant 0 : index
    %c0_17 = arith.constant 0 : index
    %c0_18 = arith.constant 0 : index
    %10 = vector.load %arg6[%c0_15, %c0_16, %c0_17, %c0_18] : memref<1x3x64x64xf32, #tpu.memory_space<vmem>>, vector<1x1x64x64xf32>
    %11 = vector.shape_cast %10 : vector<1x1x64x64xf32> to vector<64x64xf32>
    %c0_19 = arith.constant 0 : index
    %c1 = arith.constant 1 : index
    %c0_20 = arith.constant 0 : index
    %c0_21 = arith.constant 0 : index
    %12 = vector.load %arg6[%c0_19, %c1, %c0_20, %c0_21] : memref<1x3x64x64xf32, #tpu.memory_space<vmem>>, vector<1x1x64x64xf32>
    %13 = vector.shape_cast %12 : vector<1x1x64x64xf32> to vector<64x64xf32>
    %c0_22 = arith.constant 0 : index
    %c2 = arith.constant 2 : index
    %c0_23 = arith.constant 0 : index
    %c0_24 = arith.constant 0 : index
    %14 = vector.load %arg6[%c0_22, %c2, %c0_23, %c0_24] : memref<1x3x64x64xf32, #tpu.memory_space<vmem>>, vector<1x1x64x64xf32>
    %15 = vector.shape_cast %14 : vector<1x1x64x64xf32> to vector<64x64xf32>
    %c0_25 = arith.constant 0 : index
    %c0_26 = arith.constant 0 : index
    %c0_27 = arith.constant 0 : index
    %16 = vector.load %arg9[%c0_25, %c0_26, %c0_27] : memref<1x5x64xf32, #tpu.memory_space<vmem>>, vector<1x5x64xf32>
    %17 = vector.shape_cast %16 : vector<1x5x64xf32> to vector<5x64xf32>
    %18 = vector.extract_strided_slice %17 {offsets = [0, 0], sizes = [1, 64], strides = [1, 1]} : vector<5x64xf32> to vector<1x64xf32>
    %19 = vector.extract_strided_slice %17 {offsets = [1, 0], sizes = [1, 64], strides = [1, 1]} : vector<5x64xf32> to vector<1x64xf32>
    %20 = vector.extract_strided_slice %17 {offsets = [2, 0], sizes = [1, 64], strides = [1, 1]} : vector<5x64xf32> to vector<1x64xf32>
    %21 = vector.extract_strided_slice %17 {offsets = [3, 0], sizes = [1, 64], strides = [1, 1]} : vector<5x64xf32> to vector<1x64xf32>
    %22 = vector.extract_strided_slice %17 {offsets = [4, 0], sizes = [1, 64], strides = [1, 1]} : vector<5x64xf32> to vector<1x64xf32>
    %c0_28 = arith.constant 0 : index
    %c0_29 = arith.constant 0 : index
    %c0_30 = arith.constant 0 : index
    %c0_31 = arith.constant 0 : index
    %23 = vector.load %arg7[%c0_28, %c0_29, %c0_30, %c0_31] : memref<1x12x64x16xf32, #tpu.memory_space<vmem>>, vector<1x4x64x16xf32>
    %24 = vector.shape_cast %23 : vector<1x4x64x16xf32> to vector<4x64x16xf32>
    %c0_32 = arith.constant 0 : index
    %c4 = arith.constant 4 : index
    %c0_33 = arith.constant 0 : index
    %c0_34 = arith.constant 0 : index
    %25 = vector.load %arg7[%c0_32, %c4, %c0_33, %c0_34] : memref<1x12x64x16xf32, #tpu.memory_space<vmem>>, vector<1x4x64x16xf32>
    %26 = vector.shape_cast %25 : vector<1x4x64x16xf32> to vector<4x64x16xf32>
    %c0_35 = arith.constant 0 : index
    %c8 = arith.constant 8 : index
    %c0_36 = arith.constant 0 : index
    %c0_37 = arith.constant 0 : index
    %27 = vector.load %arg7[%c0_35, %c8, %c0_36, %c0_37] : memref<1x12x64x16xf32, #tpu.memory_space<vmem>>, vector<1x4x64x16xf32>
    %28 = vector.shape_cast %27 : vector<1x4x64x16xf32> to vector<4x64x16xf32>
    %c0_38 = arith.constant 0 : index
    %c0_39 = arith.constant 0 : index
    %c0_40 = arith.constant 0 : index
    %c0_41 = arith.constant 0 : index
    %29 = vector.load %arg10[%c0_38, %c0_39, %c0_40, %c0_41] : memref<1x12x1x16xf32, #tpu.memory_space<vmem>>, vector<1x4x1x16xf32>
    %30 = vector.shape_cast %29 : vector<1x4x1x16xf32> to vector<4x1x16xf32>
    %c0_42 = arith.constant 0 : index
    %c4_43 = arith.constant 4 : index
    %c0_44 = arith.constant 0 : index
    %c0_45 = arith.constant 0 : index
    %31 = vector.load %arg10[%c0_42, %c4_43, %c0_44, %c0_45] : memref<1x12x1x16xf32, #tpu.memory_space<vmem>>, vector<1x4x1x16xf32>
    %32 = vector.shape_cast %31 : vector<1x4x1x16xf32> to vector<4x1x16xf32>
    %c0_46 = arith.constant 0 : index
    %c8_47 = arith.constant 8 : index
    %c0_48 = arith.constant 0 : index
    %c0_49 = arith.constant 0 : index
    %33 = vector.load %arg10[%c0_46, %c8_47, %c0_48, %c0_49] : memref<1x12x1x16xf32, #tpu.memory_space<vmem>>, vector<1x4x1x16xf32>
    %34 = vector.shape_cast %33 : vector<1x4x1x16xf32> to vector<4x1x16xf32>
    %c0_50 = arith.constant 0 : index
    %c0_51 = arith.constant 0 : index
    %c0_52 = arith.constant 0 : index
    %c0_53 = arith.constant 0 : index
    %35 = vector.load %arg8[%c0_50, %c0_51, %c0_52, %c0_53] : memref<1x4x16x64xf32, #tpu.memory_space<vmem>>, vector<1x4x16x64xf32>
    %36 = vector.shape_cast %35 : vector<1x4x16x64xf32> to vector<4x16x64xf32>
    %cst = arith.constant dense<0.000000e+00> : vector<16x64xf32>
    %37 = tpu.matmul %1, %11, %cst {dimension_numbers = #tpu.dot_dimension_numbers<[1], [0], [0], [1], [0, 0, 1, 1], [], []>} : vector<16x64xf32>, vector<64x64xf32>, vector<16x64xf32> -> vector<16x64xf32>
    %38 = vector.broadcast %18 : vector<1x64xf32> to vector<16x64xf32>
    %39 = arith.addf %37, %38 : vector<16x64xf32>
    %40 = tpu.iota {dimensions = array<i32: 1>} : vector<16x8xi32>
    %41 = vector.broadcast %5 : vector<16x1xi32> to vector<16x8xi32>
    %42 = arith.cmpi eq, %41, %40 : vector<16x8xi32>
    %43 = arith.extui %42 : vector<16x8xi1> to vector<16x8xi32>
    %44 = arith.sitofp %43 : vector<16x8xi32> to vector<16x8xf32>
    %45 = tpu.iota {dimensions = array<i32: 0>} : vector<8x16xi32>
    %46 = vector.broadcast %7 : vector<1x16xi32> to vector<8x16xi32>
    %47 = arith.cmpi eq, %46, %45 : vector<8x16xi32>
    %48 = arith.extui %47 : vector<8x16xi1> to vector<8x16xi32>
    %49 = arith.sitofp %48 : vector<8x16xi32> to vector<8x16xf32>
    %cst_54 = arith.constant dense<0.000000e+00> : vector<8xf32>
    %50 = vector.multi_reduction <add>, %49, %cst_54 [1] : vector<8x16xf32> to vector<8xf32>
    %51 = vector.shape_cast %50 : vector<8xf32> to vector<8x1xf32>
    %cst_55 = arith.constant 9.99999993E-9 : f32
    %52 = vector.broadcast %cst_55 : f32 to vector<8x1xf32>
    %53 = arith.addf %51, %52 : vector<8x1xf32>
    %54 = tpu.reciprocal %53 {approx = true} : vector<8x1xf32> -> vector<8x1xf32>
    %cst_56 = arith.constant dense<0.000000e+00> : vector<8x64xf32>
    %55 = tpu.matmul %49, %39, %cst_56 {dimension_numbers = #tpu.dot_dimension_numbers<[1], [0], [0], [1], [0, 0, 1, 1], [], []>} : vector<8x16xf32>, vector<16x64xf32>, vector<8x64xf32> -> vector<8x64xf32>
    %56 = vector.broadcast %54 : vector<8x1xf32> to vector<8x64xf32>
    %57 = arith.mulf %55, %56 : vector<8x64xf32>
    %58 = vector.shape_cast %3 : vector<8x64xf32> to vector<1x8x64xf32>
    %59 = vector.broadcast %58 : vector<1x8x64xf32> to vector<4x8x64xf32>
    %60 = vector.shape_cast %57 : vector<8x64xf32> to vector<1x8x64xf32>
    %61 = vector.broadcast %60 : vector<1x8x64xf32> to vector<4x8x64xf32>
    "tpu.trace_start"() <{level = 10 : i32, message = "hle,hed->hld"}> : () -> ()
    %cst_57 = arith.constant dense<0.000000e+00> : vector<4x8x16xf32>
    %62 = tpu.matmul %59, %24, %cst_57 {dimension_numbers = #tpu.dot_dimension_numbers<[2], [1], [1], [2], [0, 0, 0, 1, 1, 2], [0], [0]>} : vector<4x8x64xf32>, vector<4x64x16xf32>, vector<4x8x16xf32> -> vector<4x8x16xf32>
    "tpu.trace_stop"() : () -> ()
    %63 = vector.broadcast %30 : vector<4x1x16xf32> to vector<4x8x16xf32>
    %64 = arith.addf %62, %63 : vector<4x8x16xf32>
    "tpu.trace_start"() <{level = 10 : i32, message = "hle,hed->hld"}> : () -> ()
    %cst_58 = arith.constant dense<0.000000e+00> : vector<4x8x16xf32>
    %65 = tpu.matmul %61, %26, %cst_58 {dimension_numbers = #tpu.dot_dimension_numbers<[2], [1], [1], [2], [0, 0, 0, 1, 1, 2], [0], [0]>} : vector<4x8x64xf32>, vector<4x64x16xf32>, vector<4x8x16xf32> -> vector<4x8x16xf32>
    "tpu.trace_stop"() : () -> ()
    %66 = vector.broadcast %32 : vector<4x1x16xf32> to vector<4x8x16xf32>
    %67 = arith.addf %65, %66 : vector<4x8x16xf32>
    "tpu.trace_start"() <{level = 10 : i32, message = "hle,hed->hld"}> : () -> ()
    %cst_59 = arith.constant dense<0.000000e+00> : vector<4x8x16xf32>
    %68 = tpu.matmul %61, %28, %cst_59 {dimension_numbers = #tpu.dot_dimension_numbers<[2], [1], [1], [2], [0, 0, 0, 1, 1, 2], [0], [0]>} : vector<4x8x64xf32>, vector<4x64x16xf32>, vector<4x8x16xf32> -> vector<4x8x16xf32>
    "tpu.trace_stop"() : () -> ()
    %69 = vector.broadcast %34 : vector<4x1x16xf32> to vector<4x8x16xf32>
    %70 = arith.addf %68, %69 : vector<4x8x16xf32>
    "tpu.trace_start"() <{level = 10 : i32, message = "hqd,hkd->hqk"}> : () -> ()
    %cst_60 = arith.constant dense<0.000000e+00> : vector<4x8x8xf32>
    %71 = tpu.matmul %64, %67, %cst_60 {dimension_numbers = #tpu.dot_dimension_numbers<[2], [2], [1], [1], [0, 0, 0, 1, 1, 1], [0], [0]>} : vector<4x8x16xf32>, vector<4x8x16xf32>, vector<4x8x8xf32> -> vector<4x8x8xf32>
    "tpu.trace_stop"() : () -> ()
    %72 = vector.broadcast %9 : vector<1x1x8xf32> to vector<4x8x8xf32>
    %73 = arith.addf %71, %72 : vector<4x8x8xf32>
    %cst_61 = arith.constant dense<0xFF800000> : vector<4x8xf32>
    %74 = vector.multi_reduction <maximumf>, %73, %cst_61 [2] : vector<4x8x8xf32> to vector<4x8xf32>
    %75 = vector.shape_cast %74 : vector<4x8xf32> to vector<4x8x1xf32>
    %76 = vector.broadcast %75 : vector<4x8x1xf32> to vector<4x8x8xf32>
    %77 = arith.subf %73, %76 : vector<4x8x8xf32>
    %78 = math.exp %77 : vector<4x8x8xf32>
    %cst_62 = arith.constant dense<0.000000e+00> : vector<4x8xf32>
    %79 = vector.multi_reduction <add>, %78, %cst_62 [2] : vector<4x8x8xf32> to vector<4x8xf32>
    %80 = vector.shape_cast %79 : vector<4x8xf32> to vector<4x8x1xf32>
    %81 = tpu.reciprocal %80 {approx = true} : vector<4x8x1xf32> -> vector<4x8x1xf32>
    %82 = vector.broadcast %81 : vector<4x8x1xf32> to vector<4x8x8xf32>
    %83 = arith.mulf %78, %82 : vector<4x8x8xf32>
    "tpu.trace_start"() <{level = 10 : i32, message = "hqk,hkd->hqd"}> : () -> ()
    %cst_63 = arith.constant dense<0.000000e+00> : vector<4x8x16xf32>
    %84 = tpu.matmul %83, %70, %cst_63 {dimension_numbers = #tpu.dot_dimension_numbers<[2], [1], [1], [2], [0, 0, 0, 1, 1, 2], [0], [0]>} : vector<4x8x8xf32>, vector<4x8x16xf32>, vector<4x8x16xf32> -> vector<4x8x16xf32>
    "tpu.trace_stop"() : () -> ()
    "tpu.trace_start"() <{level = 10 : i32, message = "hqd,hde->hqe"}> : () -> ()
    %cst_64 = arith.constant dense<0.000000e+00> : vector<4x8x64xf32>
    %85 = tpu.matmul %84, %36, %cst_64 {dimension_numbers = #tpu.dot_dimension_numbers<[2], [1], [1], [2], [0, 0, 0, 1, 1, 2], [0], [0]>} : vector<4x8x16xf32>, vector<4x16x64xf32>, vector<4x8x64xf32> -> vector<4x8x64xf32>
    "tpu.trace_stop"() : () -> ()
    %cst_65 = arith.constant dense<0.000000e+00> : vector<8x64xf32>
    %86 = vector.multi_reduction <add>, %85, %cst_65 [0] : vector<4x8x64xf32> to vector<8x64xf32>
    %87 = vector.broadcast %19 : vector<1x64xf32> to vector<8x64xf32>
    %88 = arith.addf %86, %87 : vector<8x64xf32>
    %cst_66 = arith.constant dense<0.000000e+00> : vector<16x64xf32>
    %89 = tpu.matmul %44, %88, %cst_66 {dimension_numbers = #tpu.dot_dimension_numbers<[1], [0], [0], [1], [0, 0, 1, 1], [], []>} : vector<16x8xf32>, vector<8x64xf32>, vector<16x64xf32> -> vector<16x64xf32>
    %cst_67 = arith.constant dense<0.000000e+00> : vector<16xf32>
    %90 = vector.multi_reduction <add>, %89, %cst_67 [1] : vector<16x64xf32> to vector<16xf32>
    %91 = vector.shape_cast %90 : vector<16xf32> to vector<16x1xf32>
    %cst_68 = arith.constant 6.400000e+01 : f32
    %92 = vector.broadcast %cst_68 : f32 to vector<16x1xf32>
    %93 = arith.divf %91, %92 : vector<16x1xf32>
    %94 = vector.broadcast %93 : vector<16x1xf32> to vector<16x64xf32>
    %95 = arith.subf %89, %94 : vector<16x64xf32>
    %96 = arith.mulf %95, %95 : vector<16x64xf32>
    %cst_69 = arith.constant dense<0.000000e+00> : vector<16xf32>
    %97 = vector.multi_reduction <add>, %96, %cst_69 [1] : vector<16x64xf32> to vector<16xf32>
    %98 = vector.shape_cast %97 : vector<16xf32> to vector<16x1xf32>
    %cst_70 = arith.constant 6.400000e+01 : f32
    %99 = vector.broadcast %cst_70 : f32 to vector<16x1xf32>
    %100 = arith.divf %98, %99 : vector<16x1xf32>
    %101 = vector.broadcast %93 : vector<16x1xf32> to vector<16x64xf32>
    %102 = arith.subf %89, %101 : vector<16x64xf32>
    %cst_71 = arith.constant 9.99999974E-6 : f32
    %103 = vector.broadcast %cst_71 : f32 to vector<16x1xf32>
    %104 = arith.addf %100, %103 : vector<16x1xf32>
    %105 = math.rsqrt %104 : vector<16x1xf32>
    %106 = vector.broadcast %105 : vector<16x1xf32> to vector<16x64xf32>
    %107 = arith.mulf %102, %106 : vector<16x64xf32>
    %108 = vector.broadcast %20 : vector<1x64xf32> to vector<16x64xf32>
    %109 = arith.mulf %107, %108 : vector<16x64xf32>
    %110 = vector.broadcast %21 : vector<1x64xf32> to vector<16x64xf32>
    %111 = arith.addf %109, %110 : vector<16x64xf32>
    %cst_72 = arith.constant dense<0.000000e+00> : vector<16x64xf32>
    %112 = tpu.matmul %39, %13, %cst_72 {dimension_numbers = #tpu.dot_dimension_numbers<[1], [0], [0], [1], [0, 0, 1, 1], [], []>} : vector<16x64xf32>, vector<64x64xf32>, vector<16x64xf32> -> vector<16x64xf32>
    %cst_73 = arith.constant dense<0.000000e+00> : vector<16x64xf32>
    %113 = tpu.matmul %111, %15, %cst_73 {dimension_numbers = #tpu.dot_dimension_numbers<[1], [0], [0], [1], [0, 0, 1, 1], [], []>} : vector<16x64xf32>, vector<64x64xf32>, vector<16x64xf32> -> vector<16x64xf32>
    %114 = arith.addf %112, %113 : vector<16x64xf32>
    %115 = vector.broadcast %22 : vector<1x64xf32> to vector<16x64xf32>
    %116 = arith.addf %114, %115 : vector<16x64xf32>
    %c0_74 = arith.constant 0 : index
    %c0_75 = arith.constant 0 : index
    %c0_76 = arith.constant 0 : index
    %117 = vector.load %arg11[%c0_74, %c0_75, %c0_76] : memref<1x16x64xf32, #tpu.memory_space<vmem>>, vector<1x16x64xf32>
    %118 = vector.shape_cast %117 : vector<1x16x64xf32> to vector<16x64xf32>
    %119 = vector.shape_cast %116 : vector<16x64xf32> to vector<1x16x64xf32>
    tpu.vector_store %arg11[%c0_74, %c0_75, %c0_76], %119 {strides = array<i32>} : memref<1x16x64xf32, #tpu.memory_space<vmem>>, vector<1x16x64xf32>,
    return
  }
  func.func @transform_0(%arg0: i32) -> (i32, i32, i32) {
    %c0_i32 = arith.constant 0 : i32
    %c0_i32_0 = arith.constant 0 : i32
    %c0_i32_1 = arith.constant 0 : i32
    return %arg0, %c0_i32, %c0_i32_0 : i32, i32, i32
  }
  func.func @transform_1(%arg0: i32) -> (i32, i32, i32) {
    %c0_i32 = arith.constant 0 : i32
    %c0_i32_0 = arith.constant 0 : i32
    %c0_i32_1 = arith.constant 0 : i32
    return %arg0, %c0_i32, %c0_i32_0 : i32, i32, i32
  }
  func.func @transform_2(%arg0: i32) -> (i32, i32, i32) {
    %c0_i32 = arith.constant 0 : i32
    %c0_i32_0 = arith.constant 0 : i32
    %c0_i32_1 = arith.constant 0 : i32
    return %arg0, %c0_i32, %c0_i32_0 : i32, i32, i32
  }
  func.func @transform_3(%arg0: i32) -> (i32, i32, i32) {
    %c0_i32 = arith.constant 0 : i32
    %c0_i32_0 = arith.constant 0 : i32
    %c0_i32_1 = arith.constant 0 : i32
    return %arg0, %c0_i32, %c0_i32_0 : i32, i32, i32
  }
  func.func @transform_4(%arg0: i32) -> (i32, i32, i32, i32) {
    %c0_i32 = arith.constant 0 : i32
    %c0_i32_0 = arith.constant 0 : i32
    %c0_i32_1 = arith.constant 0 : i32
    %c0_i32_2 = arith.constant 0 : i32
    return %arg0, %c0_i32, %c0_i32_0, %c0_i32_1 : i32, i32, i32, i32
  }
  func.func @transform_5(%arg0: i32) -> (i32, i32, i32, i32) {
    %c0_i32 = arith.constant 0 : i32
    %c0_i32_0 = arith.constant 0 : i32
    %c0_i32_1 = arith.constant 0 : i32
    %c0_i32_2 = arith.constant 0 : i32
    return %arg0, %c0_i32, %c0_i32_0, %c0_i32_1 : i32, i32, i32, i32
  }
  func.func @transform_6(%arg0: i32) -> (i32, i32, i32, i32) {
    %c0_i32 = arith.constant 0 : i32
    %c0_i32_0 = arith.constant 0 : i32
    %c0_i32_1 = arith.constant 0 : i32
    %c0_i32_2 = arith.constant 0 : i32
    return %arg0, %c0_i32, %c0_i32_0, %c0_i32_1 : i32, i32, i32, i32
  }
  func.func @transform_7(%arg0: i32) -> (i32, i32, i32, i32) {
    %c0_i32 = arith.constant 0 : i32
    %c0_i32_0 = arith.constant 0 : i32
    %c0_i32_1 = arith.constant 0 : i32
    %c0_i32_2 = arith.constant 0 : i32
    return %arg0, %c0_i32, %c0_i32_0, %c0_i32_1 : i32, i32, i32, i32
  }
  func.func @transform_8(%arg0: i32) -> (i32, i32, i32) {
    %c0_i32 = arith.constant 0 : i32
    %c0_i32_0 = arith.constant 0 : i32
    %c0_i32_1 = arith.constant 0 : i32
    return %arg0, %c0_i32, %c0_i32_0 : i32, i32, i32
  }
  func.func @transform_9(%arg0: i32) -> (i32, i32, i32, i32) {
    %c0_i32 = arith.constant 0 : i32
    %c0_i32_0 = arith.constant 0 : i32
    %c0_i32_1 = arith.constant 0 : i32
    %c0_i32_2 = arith.constant 0 : i32
    return %arg0, %c0_i32, %c0_i32_0, %c0_i32_1 : i32, i32, i32, i32
  }
  func.func @transform_10(%arg0: i32) -> (i32, i32, i32) {
    %c0_i32 = arith.constant 0 : i32
    %c0_i32_0 = arith.constant 0 : i32
    %c0_i32_1 = arith.constant 0 : i32
    return %arg0, %c0_i32, %c0_i32_0 : i32, i32, i32
  }
}

</mosaic_0001>

<bundles_post_ra>
// kernel: anchor3_forward.1
= control target key start
LH: loop header
LB: loop body
LE: loop exit
PB: predicated region body
PF: predicated region fallthrough
CT: control target
= control target key end

     0   :  { %s3985_s13 = smov 0   ;;  %s4480_s0 = inlined_call_operand.vmem [shape: f32[2,16,64], index: 0, kind: input, shape index: {}]   ;;  %s4481_s1 = inlined_call_operand.vmem [shape: f32[2,8,64], index: 1, kind: input, shape index: {}]   ;;  %s4482_s2 = inlined_call_operand.vmem [shape: s32[2,16,1], index: 2, kind: input, shape index: {}]   ;;  %s4483_s3 = inlined_call_operand.vmem [shape: s32[2,1,16], index: 3, kind: input, shape index: {}]   ;;  %s4484_s4 = inlined_call_operand.vmem [shape: f32[2,1,1,8], index: 4, kind: input, shape index: {}]   ;;  %s4485_s5 = inlined_call_operand.vmem [shape: f32[2,3,64,64], index: 5, kind: input, shape index: {}]   ;;  %s4486_s6 = inlined_call_operand.vmem [shape: f32[2,12,64,16], index: 6, kind: input, shape index: {}]   ;;  %s4487_s7 = inlined_call_operand.vmem [shape: f32[2,4,16,64], index: 7, kind: input, shape index: {}]   ;;  %s4488_s8 = inlined_call_operand.vmem [shape: f32[2,5,64], index: 8, kind: input, shape index: {}]   ;;  %s4489_s9 = inlined_call_operand.vmem [shape: f32[2,12,1,16], index: 9, kind: input, shape index: {}]   ;;  %s4490_s10 = inlined_call_operand.vmem [shape: f32[2,16,64], index: 10, kind: output, shape index: {}]  }
   0x1 LB: > { %s3178_s14 = sadd.s32 4294967295, %s3925_s13   ;;  %p3182_p0 = scmp.ge.s32.totalorder %s3925_s13, 1  ;;  %s3925_s13 = sphi %s3985_s13, %s20_s13  }
   0x2   : > { %p395_p1 = scmp.lt.s32.totalorder %s3925_s13, 3 }
   0x4   : > { %p396_p2 = pnand %p3182_p0, %p395_p1 }
   0x5   : > { %p471_p3 = scmp.lt.s32.totalorder (!%p396_p2), %s3178_s14, 1 }
   0x6   : > { %399 = sbr.rel (%p396_p2) target bundleno = 2250 (0x8ca), region = 60 }
   0xb   : > { %s4492_s14 = smov (!%p471_p3, %s3178_s14), 1  ;;  %vm677_vm0 = vcmask 523264   ;;  %v673_v10 = vlaneseq  ;;  %v3927_v12 = vmov 0.0   ;;  %vm3928_vm2 = vmmov 0  }
   0xc   : > { %s3880_s15 = smul.u32 192, %s4492_s14  ;;  %s3997_s16 = sshll.u32 %s4492_s14, 4  ;;  %3534 = vmatprep.subr.mxu1 %v3927_v12  ;;  %3538 = vmatprep.mubr.msk.f32.mxu1 %vm3928_vm2, %v3927_v12  ;;  %vm782_vm3 = vcmask 130048   ;;  %vm2090_vm4 = vcmask 64512  }
   0xd   : > { %s475_s19 = scalar_lea.vmem %s4480_s0, %s3997_s16  ;;  %s3881_s23 = smul.u32 768, %s4492_s14  ;;  %v4020_v11 = vshrl.u32 %v673_v10, 7 }
   0xe   : > { %s4006_s22 = scalar_lea.vmem %s4485_s5, %s3880_s15  ;;  %v519_v0 = vld [vmem:[%s475_s19] sm:$0xff]  ;;  %v520_v9 = vld [vmem:[%s475_s19 + $0x8] sm:$0xff]  ;;  %s487_s26 = scalar_lea.vmem %s4483_s3, %s4492_s14 }
   0xf   : > { %v533_v1 = vld [vmem:[%s4006_s22 + $0x38] sm:$0xff]  ;;  %v532_v2 = vld [vmem:[%s4006_s22 + $0x30] sm:$0xff]  ;;  %3531 = vmatprep.mubr.msk.f32.mxu0 %vm677_vm0, %v519_v0  ;;  %v531_v3 = vld [vmem:[%s4006_s22 + $0x28] sm:$0xff]  ;;  %s4032_s29 = scalar_lea.vmem %s4486_s6, %s3881_s23  ;;  %s3185_s30 = sshll.u32 %s4492_s14, 3  ;;  %v675_v40 = vsub.s32 0, %v4020_v11 }
  0x10   : > { %3515 = vmatprep.subr.mxu0 %v533_v1  ;;  %v530_v4 = vld [vmem:[%s4006_s22 + $0x20] sm:$0xff]  ;;  %v529_v5 = vld [vmem:[%s4006_s22 + $0x18] sm:$0xff]  ;;  %v528_v6 = vld [vmem:[%s4006_s22 + $0x10] sm:$0xff]  ;;  %s479_s15 = scalar_lea.vmem %s4481_s1, %s3185_s30  ;;  %s4110_s19 = scalar_lea.vmem %s4488_s8, %s3185_s30 }
  0x11   : > { %3516 = vmatpush3.msra.mxu0 %v533_v1  ;;  %v527_v7 = vld [vmem:[%s4006_s22 + $0x8] sm:$0xff]  ;;  %v526_v8 = vld [vmem:[%s4006_s22] sm:$0xff]  ;;  %v568_v16 = vld [vmem:[%s4032_s29 + $0x78] sm:$0xff]  ;;  %s3882_s20 = smul.u32 12, %s4492_s14  ;;  %s490_s27 = scalar_lea.vmem %s4484_s4, %s4492_s14 }
  0x12   : > { %3517 = vmatprep.subr.mxu0 %v532_v2  ;;  %v3287_v13 = vld [vmem:[%s487_s26] ss:$0 sm:$0xff]  ;;  %v567_v17 = vld [vmem:[%s4032_s29 + $0x70] sm:$0xff]  ;;  %v566_v18 = vld [vmem:[%s4032_s29 + $0x68] sm:$0xff]  ;;  %s3341_s28 = sshll.u32 %s4492_s14, 6  ;;  %s518_s18 = scalar_lea.vmem %s4490_s10, %s3997_s16 }
  0x13   : > { %3518 = vmatpush3.msra.mxu0 %v532_v2  ;;  %vm779_vm1 = vcmp.eq.s32.totalorder %v3287_v13, %v4020_v11  ;;  %v565_v19 = vld [vmem:[%s4032_s29 + $0x60] sm:$0xff]  ;;  %v564_v20 = vld [vmem:[%s4032_s29 + $0x58] sm:$0xff]  ;;  %v563_v21 = vld [vmem:[%s4032_s29 + $0x50] sm:$0xff]  ;;  %s4329_s24 = scalar_lea.vmem %s4489_s9, %s3882_s20  ;;  %s4396_s11 = scalar_lea.vmem %s4487_s7, %s3341_s28 }
  0x14   : > { %3519 = vmatprep.subr.mxu0 %v531_v3  ;;  %v4037_v14 = vsel %vm779_vm1, 1.0, %v3927_v12  ;;  %v562_v22 = vld [vmem:[%s4032_s29 + $0x48] sm:$0xff]  ;;  %v561_v23 = vld [vmem:[%s4032_s29 + $0x40] sm:$0xff]  ;;  %v584_v25 = vld [vmem:[%s4032_s29 + $0xf8] sm:$0xff] }
  0x15   : > { %3520 = vmatpush3.msra.mxu0 %v531_v3  ;;  %v783_v15 = vsel %vm782_vm3, %v4037_v14, 0.0  ;;  %v4064_v24 = vld [vmem:[%s479_s15] sm:$0xff]  ;;  %v583_v26 = vld [vmem:[%s4032_s29 + $0xf0] sm:$0xff]  ;;  %v582_v27 = vld [vmem:[%s4032_s29 + $0xe8] sm:$0xff]  ;;  %s484_s15 = scalar_lea.vmem %s4482_s2, %s3997_s16 }
  0x16   : > { %3521 = vmatprep.subr.mxu0 %v530_v4  ;;  %784 = vadd.xlane.f32.xlu0 %v783_v15  ;;  %v581_v28 = vld [vmem:[%s4032_s29 + $0xe0] sm:$0xff]  ;;  %v580_v29 = vld [vmem:[%s4032_s29 + $0xd8] sm:$0xff]  ;;  %v579_v30 = vld [vmem:[%s4032_s29 + $0xd0] sm:$0xff] }
  0x17   : > { %3522 = vmatpush3.msra.mxu0 %v530_v4  ;;  %v578_v31 = vld [vmem:[%s4032_s29 + $0xc8] sm:$0xff]  ;;  %v577_v32 = vld [vmem:[%s4032_s29 + $0xc0] sm:$0xff]  ;;  %v3226_v33 = vld [vmem:[%s4032_s29 + $0x178] sm:$0xff] }
  0x18   : > { %3523 = vmatprep.subr.mxu0 %v529_v5  ;;  %v3225_v34 = vld [vmem:[%s4032_s29 + $0x170] sm:$0xff]  ;;  %v3224_v35 = vld [vmem:[%s4032_s29 + $0x168] sm:$0xff]  ;;  %v3223_v36 = vld [vmem:[%s4032_s29 + $0x160] sm:$0xff] }
  0x19   : > { %3524 = vmatpush3.msra.mxu0 %v529_v5  ;;  %v3222_v37 = vld [vmem:[%s4032_s29 + $0x158] sm:$0xff]  ;;  %v3221_v38 = vld [vmem:[%s4032_s29 + $0x150] sm:$0xff]  ;;  %v3220_v39 = vld [vmem:[%s4032_s29 + $0x148] sm:$0xff] }
  0x1a   : > { %3525 = vmatprep.subr.mxu0 %v528_v6  ;;  %v4114_v41 = vld [vmem:[%s4110_s19] sm:$0x1f]  ;;  %v560_v47 = vld [vmem:[%s4032_s29 + $0x38] sm:$0xff]  ;;  %v559_v48 = vld [vmem:[%s4032_s29 + $0x30] sm:$0xff] }
  0x1b   : > { %3526 = vmatpush3.msra.mxu0 %v528_v6  ;;  %v676_v42 = vrot.slane %v4114_v41, %v675_v40  ;;  %v558_v49 = vld [vmem:[%s4032_s29 + $0x28] sm:$0xff]  ;;  %v557_v50 = vld [vmem:[%s4032_s29 + $0x20] sm:$0xff]  ;;  %v556_v51 = vld [vmem:[%s4032_s29 + $0x18] sm:$0xff] }
  0x1c   : > { %3527 = vmatprep.subr.mxu0 %v527_v7  ;;  %v555_v52 = vld [vmem:[%s4032_s29 + $0x10] sm:$0xff]  ;;  %v554_v53 = vld [vmem:[%s4032_s29 + $0x8] sm:$0xff]  ;;  %v553_v54 = vld [vmem:[%s4032_s29] sm:$0xff] }
  0x1d   : > { %3528 = vmatpush3.msra.mxu0 %v527_v7  ;;  %v576_v55 = vld [vmem:[%s4032_s29 + $0xb8] sm:$0xff]  ;;  %v575_v56 = vld [vmem:[%s4032_s29 + $0xb0] sm:$0xff]  ;;  %v574_v57 = vld [vmem:[%s4032_s29 + $0xa8] sm:$0xff] }
  0x1e   : > { %3529 = vmatprep.subr.mxu0 %v526_v8  ;;  %v573_v58 = vld [vmem:[%s4032_s29 + $0xa0] sm:$0xff]  ;;  %v572_v59 = vld [vmem:[%s4032_s29 + $0x98] sm:$0xff]  ;;  %v571_v60 = vld [vmem:[%s4032_s29 + $0x90] sm:$0xff] }
  0x1f   : > { %3530 = vmatpush3.msra.mxu0 %v526_v8  ;;  %v570_v61 = vld [vmem:[%s4032_s29 + $0x88] sm:$0xff]  ;;  %v569_v62 = vld [vmem:[%s4032_s29 + $0x80] sm:$0xff]  ;;  %v3218_v63 = vld [vmem:[%s4032_s29 + $0x138] sm:$0xff] }
  0x20   : > { %3532 = vmatmul.mubr.msk.f32.vlgmr.msra.gmra.mxu0 %vm677_vm0, %v520_v9  ;;  %3560 = vmatprep.subr.mxu0 %v3927_v12  ;;  %v3217_v0 = vld [vmem:[%s4032_s29 + $0x130] sm:$0xff]  ;;  %v3216_v1 = vld [vmem:[%s4032_s29 + $0x128] sm:$0xff]  ;;  %v3215_v2 = vld [vmem:[%s4032_s29 + $0x120] sm:$0xff] }
  0x21   : > { %3576 = vmatprep.mubr.msk.f32.mxu0 %vm3928_vm2, %v3927_v12  ;;  %3561 = vmatpush3.msra.mxu0 %v568_v16  ;;  %v3214_v3 = vld [vmem:[%s4032_s29 + $0x118] sm:$0xff]  ;;  %v3213_v4 = vld [vmem:[%s4032_s29 + $0x110] sm:$0xff]  ;;  %v3212_v5 = vld [vmem:[%s4032_s29 + $0x108] sm:$0xff] }
  0x22   : > { %3562 = vmatprep.subr.mxu0 %v3927_v12  ;;  %v3211_v6 = vld [vmem:[%s4032_s29 + $0x100] sm:$0xff]  ;;  %v3258_v40 = vld [vmem:[%s4032_s29 + $0x278] sm:$0xff] }
  0x23   : > { %3563 = vmatpush3.msra.mxu0 %v567_v17  ;;  %v3219_v7 = vld [vmem:[%s4032_s29 + $0x140] sm:$0xff] }
  0x24   : > { %3564 = vmatprep.subr.mxu0 %v3927_v12 }
  0x25   : > { %3565 = vmatpush3.msra.mxu0 %v566_v18 }
  0x26   : > { %3566 = vmatprep.subr.mxu0 %v3927_v12 }
  0x27   : > { %3567 = vmatpush3.msra.mxu0 %v565_v19 }
  0x28   : > { %3568 = vmatprep.subr.mxu0 %v3927_v12 }
  0x29   : > { %3569 = vmatpush3.msra.mxu0 %v564_v20  ;;  %v3234_v20 = vld [vmem:[%s4032_s29 + $0x1b8] sm:$0xff] }
  0x2a   : > { %3570 = vmatprep.subr.mxu0 %v3927_v12 }
  0x2b   : > { %3571 = vmatpush3.msra.mxu0 %v563_v21  ;;  %v3242_v21 = vld [vmem:[%s4032_s29 + $0x1f8] sm:$0xff] }
  0x2c   : > { %3572 = vmatprep.subr.mxu0 %v3927_v12 }
  0x2d   : > { %3573 = vmatpush3.msra.mxu0 %v562_v22 }
  0x2e   : > { %3574 = vmatprep.subr.mxu0 %v3927_v12 }
  0x2f   : > { %3575 = vmatpush3.msra.mxu0 %v561_v23  ;;  %v3233_v23 = vld [vmem:[%s4032_s29 + $0x1b0] sm:$0xff] }
  0x30   : > { %3598 = vmatprep.subr.mxu0 %v3927_v12  ;;  %3577 = vmatmul.mubr.msk.f32.vlgmr.msra.gmra.mxu0 %vm677_vm0, %v4064_v24 }
  0x31   : > { %3599 = vmatpush3.msra.mxu0 %v584_v25  ;;  %3614 = vmatprep.mubr.msk.f32.mxu0 %vm3928_vm2, %v3927_v12  ;;  %v3232_v25 = vld [vmem:[%s4032_s29 + $0x1a8] sm:$0xff] }
  0x32   : > { %3600 = vmatprep.subr.mxu0 %v3927_v12 }
  0x33   : > { %3601 = vmatpush3.msra.mxu0 %v583_v26  ;;  %v3240_v26 = vld [vmem:[%s4032_s29 + $0x1e8] sm:$0xff] }
  0x34   : > { %3602 = vmatprep.subr.mxu0 %v3927_v12 }
  0x35   : > { %3603 = vmatpush3.msra.mxu0 %v582_v27  ;;  %v3231_v27 = vld [vmem:[%s4032_s29 + $0x1a0] sm:$0xff] }
  0x36   : > { %3604 = vmatprep.subr.mxu0 %v3927_v12 }
  0x37   : > { %3605 = vmatpush3.msra.mxu0 %v581_v28  ;;  %v3239_v28 = vld [vmem:[%s4032_s29 + $0x1e0] sm:$0xff] }
  0x38   : > { %3606 = vmatprep.subr.mxu0 %v3927_v12 }
  0x39   : > { %3607 = vmatpush3.msra.mxu0 %v580_v29  ;;  %v3230_v29 = vld [vmem:[%s4032_s29 + $0x198] sm:$0xff] }
  0x3a   : > { %3608 = vmatprep.subr.mxu0 %v3927_v12 }
  0x3b   : > { %3609 = vmatpush3.msra.mxu0 %v579_v30  ;;  %v3238_v30 = vld [vmem:[%s4032_s29 + $0x1d8] sm:$0xff] }
  0x3c   : > { %3610 = vmatprep.subr.mxu0 %v3927_v12 }
  0x3d   : > { %3611 = vmatpush3.msra.mxu0 %v578_v31  ;;  %v3229_v31 = vld [vmem:[%s4032_s29 + $0x190] sm:$0xff] }
  0x3e   : > { %3612 = vmatprep.subr.mxu0 %v3927_v12 }
  0x3f   : > { %3613 = vmatpush3.msra.mxu0 %v577_v32  ;;  %v3237_v32 = vld [vmem:[%s4032_s29 + $0x1d0] sm:$0xff] }
  0x40   : > { %3636 = vmatprep.subr.mxu0 %v3927_v12  ;;  %3615 = vmatmul.mubr.msk.f32.vlgmr.msra.gmra.mxu0 %vm677_vm0, %v4064_v24 }
  0x41   : > { %3637 = vmatpush3.msra.mxu0 %v3226_v33  ;;  %3652 = vmatprep.mubr.msk.f32.mxu0 %vm3928_vm2, %v3927_v12  ;;  %v3228_v33 = vld [vmem:[%s4032_s29 + $0x188] sm:$0xff] }
  0x42   : > { %3638 = vmatprep.subr.mxu0 %v3927_v12 }
  0x43   : > { %3639 = vmatpush3.msra.mxu0 %v3225_v34  ;;  %v3236_v34 = vld [vmem:[%s4032_s29 + $0x1c8] sm:$0xff] }
  0x44   : > { %3640 = vmatprep.subr.mxu0 %v3927_v12 }
  0x45   : > { %3641 = vmatpush3.msra.mxu0 %v3224_v35  ;;  %v3227_v35 = vld [vmem:[%s4032_s29 + $0x180] sm:$0xff] }
  0x46   : > { %3642 = vmatprep.subr.mxu0 %v3927_v12 }
  0x47   : > { %3643 = vmatpush3.msra.mxu0 %v3223_v36  ;;  %v3235_v36 = vld [vmem:[%s4032_s29 + $0x1c0] sm:$0xff] }
  0x48   : > { %3644 = vmatprep.subr.mxu0 %v3927_v12 }
  0x49   : > { %3645 = vmatpush3.msra.mxu0 %v3222_v37 }
  0x4a   : > { %3646 = vmatprep.subr.mxu0 %v3927_v12 }
  0x4b   : > { %3647 = vmatpush3.msra.mxu0 %v3221_v38 }
  0x4c   : > { %3648 = vmatprep.subr.mxu0 %v3927_v12 }
  0x4d   : > { %3649 = vmatpush3.msra.mxu0 %v3220_v39  ;;  %v3250_v39 = vld [vmem:[%s4032_s29 + $0x238] sm:$0xff] }
  0x4e   : > { %3650 = vmatprep.subr.mxu0 %v3927_v12 }
  0x4f   : > { %3651 = vmatpush3.msra.mxu0 %v3219_v7  ;;  %v3269_v7 = vld [vmem:[%s4032_s29 + $0x2d0] sm:$0xff] }
  0x50   : > { %3674 = vmatprep.subr.mxu0 %v3927_v12 }
  0x9f   : > { %v785_v15 = vpop.xlane.xlu0 %784 }
  0xa0   : > { %v786_v16 = vadd.f32 1e-08, %v785_v15  ;;  %v3259_v15 = vld [vmem:[%s4032_s29 + $0x280] sm:$0xff] }
  0xa2   : > { %3896 = vrcp.f32 %v786_v16  ;;  %v3267_v16 = vld [vmem:[%s4032_s29 + $0x2c0] sm:$0xff] }
  0xaf   : > { %v3897_v17 = vpop.eup %3896 }
  0xe0   : > { %v3533_v43 = vpop.f32.mrf.mxu0 }
  0xe1   : > { %v4117_v44 = vadd.f32 %v3533_v43, %v676_v42  ;;  %v3257_v43 = vld [vmem:[%s4032_s29 + $0x270] sm:$0xff] }
  0xe2   : > { %v750_v45 = vpop.f32.mrf.mxu0 }
  0xe3   : > { %v4119_v46 = vadd.f32 %v750_v45, %v676_v42  ;;  %3535 = vmatpush3.msra.mxu1 %v4117_v44  ;;  %v3249_v42 = vld [vmem:[%s4032_s29 + $0x230] sm:$0xff]  ;;  %v3248_v45 = vld [vmem:[%s4032_s29 + $0x228] sm:$0xff] }
  0xe4   : > { %3536 = vmatprep.subr.mxu1 %v3927_v12 }
  0xe5   : > { %3537 = vmatpush3.msra.mxu1 %v4119_v46 }
  0xe6   : > { %3539 = vmatmul.mubr.msk.f32.vlgmr.msra.gmra.mxu1 %vm782_vm3, %v4037_v14  ;;  %3541 = vmatprep.subr.mxu1 %v3927_v12 }
  0xe7   : > { %3542 = vmatpush3.msra.mxu1 %v560_v47  ;;  %3557 = vmatprep.mubr.msk.f32.mxu1 %vm3928_vm2, %v3927_v12  ;;  %v3256_v47 = vld [vmem:[%s4032_s29 + $0x268] sm:$0xff] }
  0xe8   : > { %3543 = vmatprep.subr.mxu1 %v3927_v12 }
  0xe9   : > { %3544 = vmatpush3.msra.mxu1 %v559_v48  ;;  %v3247_v48 = vld [vmem:[%s4032_s29 + $0x220] sm:$0xff] }
  0xea   : > { %3545 = vmatprep.subr.mxu1 %v3927_v12 }
  0xeb   : > { %3546 = vmatpush3.msra.mxu1 %v558_v49  ;;  %v3255_v49 = vld [vmem:[%s4032_s29 + $0x260] sm:$0xff] }
  0xec   : > { %3547 = vmatprep.subr.mxu1 %v3927_v12 }
  0xed   : > { %3548 = vmatpush3.msra.mxu1 %v557_v50  ;;  %v3246_v50 = vld [vmem:[%s4032_s29 + $0x218] sm:$0xff] }
  0xee   : > { %3549 = vmatprep.subr.mxu1 %v3927_v12 }
  0xef   : > { %3550 = vmatpush3.msra.mxu1 %v556_v51  ;;  %v3254_v51 = vld [vmem:[%s4032_s29 + $0x258] sm:$0xff] }
  0xf0   : > { %3551 = vmatprep.subr.mxu1 %v3927_v12  ;;  %v4187_v8 = vpop.f32.mrf.mxu0 }
  0xf1   : > { %3552 = vmatpush3.msra.mxu1 %v555_v52  ;;  %v3245_v52 = vld [vmem:[%s4032_s29 + $0x210] sm:$0xff] }
  0xf2   : > { %3553 = vmatprep.subr.mxu1 %v3927_v12  ;;  %v3578_v9 = vpop.f32.mrf.mxu0 }
  0xf3   : > { %3554 = vmatpush3.msra.mxu1 %v554_v53  ;;  %v3253_v53 = vld [vmem:[%s4032_s29 + $0x250] sm:$0xff]  ;;  %v3260_v9 = vld [vmem:[%s4032_s29 + $0x288] sm:$0xff] }
  0xf4   : > { %3555 = vmatprep.subr.mxu1 %v3927_v12 }
  0xf5   : > { %3556 = vmatpush3.msra.mxu1 %v553_v54  ;;  %v3244_v54 = vld [vmem:[%s4032_s29 + $0x208] sm:$0xff] }
  0xf6   : > { %3558 = vmatmul.mubr.msk.f32.vlgmr.msra.gmra.mxu1 %vm677_vm0, %v4064_v24  ;;  %3579 = vmatprep.subr.mxu1 %v3927_v12 }
  0xf7   : > { %3580 = vmatpush3.msra.mxu1 %v576_v55  ;;  %3595 = vmatprep.mubr.msk.f32.mxu1 %vm3928_vm2, %v3927_v12  ;;  %v3252_v55 = vld [vmem:[%s4032_s29 + $0x248] sm:$0xff] }
  0xf8   : > { %3581 = vmatprep.subr.mxu1 %v3927_v12 }
  0xf9   : > { %3582 = vmatpush3.msra.mxu1 %v575_v56 }
  0xfa   : > { %3583 = vmatprep.subr.mxu1 %v3927_v12 }
  0xfb   : > { %3584 = vmatpush3.msra.mxu1 %v574_v57  ;;  %v3243_v57 = vld [vmem:[%s4032_s29 + $0x200] sm:$0xff] }
  0xfc   : > { %3585 = vmatprep.subr.mxu1 %v3927_v12 }
  0xfd   : > { %3586 = vmatpush3.msra.mxu1 %v573_v58  ;;  %v3251_v58 = vld [vmem:[%s4032_s29 + $0x240] sm:$0xff] }
  0xfe   : > { %3587 = vmatprep.subr.mxu1 %v3927_v12 }
  0xff   : > { %3588 = vmatpush3.msra.mxu1 %v572_v59 }
 0x100   : > { %3589 = vmatprep.subr.mxu1 %v3927_v12  ;;  %v4189_v13 = vpop.f32.mrf.mxu0 }
 0x101   : > { %3590 = vmatpush3.msra.mxu1 %v571_v60  ;;  %v3266_v60 = vld [vmem:[%s4032_s29 + $0x2b8] sm:$0xff] }
 0x102   : > { %3591 = vmatprep.subr.mxu1 %v3927_v12  ;;  %v3616_v14 = vpop.f32.mrf.mxu0 }
 0x103   : > { %3592 = vmatpush3.msra.mxu1 %v570_v61  ;;  %v3274_v61 = vld [vmem:[%s4032_s29 + $0x2f8] sm:$0xff]  ;;  %v3268_v14 = vld [vmem:[%s4032_s29 + $0x2c8] sm:$0xff] }
 0x104   : > { %3593 = vmatprep.subr.mxu1 %v3927_v12 }
 0x105   : > { %3594 = vmatpush3.msra.mxu1 %v569_v62  ;;  %v3265_v62 = vld [vmem:[%s4032_s29 + $0x2b0] sm:$0xff] }
 0x106   : > { %3596 = vmatmul.mubr.msk.f32.vlgmr.msra.gmra.mxu1 %vm677_vm0, %v4064_v24  ;;  %3617 = vmatprep.subr.mxu1 %v3927_v12  ;;  %v3241_v24 = vld [vmem:[%s4032_s29 + $0x1f0] sm:$0xff] }
 0x107   : > { %3618 = vmatpush3.msra.mxu1 %v3218_v63  ;;  %3633 = vmatprep.mubr.msk.f32.mxu1 %vm3928_vm2, %v3927_v12  ;;  %v3273_v63 = vld [vmem:[%s4032_s29 + $0x2f0] sm:$0xff] }
 0x108   : > { %3619 = vmatprep.subr.mxu1 %v3927_v12 }
 0x109   : > { %3620 = vmatpush3.msra.mxu1 %v3217_v0  ;;  %v3264_v0 = vld [vmem:[%s4032_s29 + $0x2a8] sm:$0xff] }
 0x10a   : > { %3621 = vmatprep.subr.mxu1 %v3927_v12 }
 0x10b   : > { %3622 = vmatpush3.msra.mxu1 %v3216_v1  ;;  %v3272_v1 = vld [vmem:[%s4032_s29 + $0x2e8] sm:$0xff] }
 0x10c   : > { %3623 = vmatprep.subr.mxu1 %v3927_v12 }
 0x10d   : > { %3624 = vmatpush3.msra.mxu1 %v3215_v2  ;;  %v3263_v2 = vld [vmem:[%s4032_s29 + $0x2a0] sm:$0xff] }
 0x10e   : > { %3625 = vmatprep.subr.mxu1 %v3927_v12 }
 0x10f   : > { %3626 = vmatpush3.msra.mxu1 %v3214_v3  ;;  %v3271_v3 = vld [vmem:[%s4032_s29 + $0x2e0] sm:$0xff] }
 0x110   : > { %3627 = vmatprep.subr.mxu1 %v3927_v12 }
 0x111   : > { %3628 = vmatpush3.msra.mxu1 %v3213_v4  ;;  %v3262_v4 = vld [vmem:[%s4032_s29 + $0x298] sm:$0xff] }
 0x112   : > { %3629 = vmatprep.subr.mxu1 %v3927_v12 }
 0x113   : > { %3630 = vmatpush3.msra.mxu1 %v3212_v5  ;;  %v3270_v5 = vld [vmem:[%s4032_s29 + $0x2d8] sm:$0xff] }
 0x114   : > { %3631 = vmatprep.subr.mxu1 %v3927_v12 }
 0x115   : > { %3632 = vmatpush3.msra.mxu1 %v3211_v6  ;;  %v3261_v6 = vld [vmem:[%s4032_s29 + $0x290] sm:$0xff] }
 0x116   : > { %3655 = vmatprep.subr.mxu1 %v3927_v12 }
 0x1a6   : > { %v857_v18 = vpop.f32.mrf.mxu1 }
 0x1a7   : > { %v4191_v19 = vmul.f32 %v3897_v17, %v857_v18  ;;  %v3298_v17 = vld [vmem:[%s4329_s24 + $0x4] ss:$0 sm:$0xff] }
 0x1a8   : > { %v3540_v22 = vpop.f32.mrf.mxu1 }
 0x1a9   : > { %3634 = vmatmul.mubr.msk.f32.vlgmr.msra.gmra.mxu1 %vm677_vm0, %v4191_v19  ;;  %3653 = vmatmul.mubr.msk.f32.vlgmr.msra.gmra.mxu0 %vm677_vm0, %v4191_v19  ;;  %v3299_v22 = vld [vmem:[%s4329_s24 + $0x5] ss:$0 sm:$0xff] }
 0x1aa   : > { %3656 = vmatpush3.msra.mxu1 %v3234_v20  ;;  %3675 = vmatpush3.msra.mxu0 %v3242_v21  ;;  %v3290_v20 = vld [vmem:[%s4329_s24] ss:$0 sm:$0xff] }
 0x1ab   : > { %3657 = vmatprep.subr.mxu1 %v3927_v12  ;;  %3676 = vmatprep.subr.mxu0 %v3927_v12 }
 0x1ac   : > { %3658 = vmatpush3.msra.mxu1 %v3233_v23  ;;  %3677 = vmatpush3.msra.mxu0 %v3241_v24 }
 0x1ad   : > { %3659 = vmatprep.subr.mxu1 %v3927_v12  ;;  %3678 = vmatprep.subr.mxu0 %v3927_v12 }
 0x1ae   : > { %3660 = vmatpush3.msra.mxu1 %v3232_v25  ;;  %3679 = vmatpush3.msra.mxu0 %v3240_v26  ;;  %v3291_v26 = vld [vmem:[%s4329_s24 + $0x1] ss:$0 sm:$0xff] }
 0x1af   : > { %3661 = vmatprep.subr.mxu1 %v3927_v12  ;;  %3680 = vmatprep.subr.mxu0 %v3927_v12 }
 0x1b0   : > { %3662 = vmatpush3.msra.mxu1 %v3231_v27  ;;  %3681 = vmatpush3.msra.mxu0 %v3239_v28  ;;  %v1026_v28 = vadd.f32 %v3291_v26, %v4187_v8 }
 0x1b1   : > { %3663 = vmatprep.subr.mxu1 %v3927_v12  ;;  %3682 = vmatprep.subr.mxu0 %v3927_v12 }
 0x1b2   : > { %3664 = vmatpush3.msra.mxu1 %v3230_v29  ;;  %3683 = vmatpush3.msra.mxu0 %v3238_v30  ;;  %v3300_v29 = vld [vmem:[%s4329_s24 + $0x6] ss:$0 sm:$0xff]  ;;  %v3301_v30 = vld [vmem:[%s4329_s24 + $0x7] ss:$0 sm:$0xff] }
 0x1b3   : > { %3665 = vmatprep.subr.mxu1 %v3927_v12  ;;  %3684 = vmatprep.subr.mxu0 %v3927_v12 }
 0x1b4   : > { %3666 = vmatpush3.msra.mxu1 %v3229_v31  ;;  %3685 = vmatpush3.msra.mxu0 %v3237_v32 }
 0x1b5   : > { %3667 = vmatprep.subr.mxu1 %v3927_v12  ;;  %3686 = vmatprep.subr.mxu0 %v3927_v12 }
 0x1b6   : > { %3668 = vmatpush3.msra.mxu1 %v3228_v33  ;;  %3687 = vmatpush3.msra.mxu0 %v3236_v34  ;;  %v4225_v37 = vpop.f32.mrf.mxu1  ;;  %v3292_v33 = vld [vmem:[%s4329_s24 + $0x2] ss:$0 sm:$0xff]  ;;  %v3293_v34 = vld [vmem:[%s4329_s24 + $0x3] ss:$0 sm:$0xff] }
 0x1b7   : > { %3669 = vmatprep.subr.mxu1 %v3927_v12  ;;  %3688 = vmatprep.subr.mxu0 %v3927_v12  ;;  %v956_v25 = vadd.f32 %v3290_v20, %v4225_v37 }
 0x1b8   : > { %3670 = vmatpush3.msra.mxu1 %v3227_v35  ;;  %3671 = vmatprep.mubr.msk.f32.mxu1 %vm3928_vm2, %v3927_v12  ;;  %v3559_v38 = vpop.f32.mrf.mxu1 }
 0x1b9   : > { %3689 = vmatpush3.msra.mxu0 %v3235_v36  ;;  %3690 = vmatprep.mubr.msk.f32.mxu0 %vm3928_vm2, %v3927_v12 }
 0x1ba   : > { %3672 = vmatmul.mubr.msk.f32.vlgmr.msra.gmra.mxu1 %vm677_vm0, %v4191_v19  ;;  %3691 = vmatmul.mubr.msk.f32.vlgmr.msra.gmra.mxu0 %vm677_vm0, %v4191_v19 }
 0x1bb   : > { %3693 = vmatprep.subr.mxu1 %v3927_v12  ;;  %3712 = vmatprep.subr.mxu0 %v3927_v12 }
 0x1bc   : > { %3694 = vmatpush3.msra.mxu1 %v3250_v39  ;;  %3713 = vmatpush3.msra.mxu0 %v3258_v40  ;;  %v1166_v39 = vadd.f32 %v3293_v34, %v4189_v13  ;;  %v3306_v40 = vld [vmem:[%s4329_s24 + $0x8] ss:$0 sm:$0xff]  ;;  %v3308_v34 = vld [vmem:[%s4329_s24 + $0xa] ss:$0 sm:$0xff] }
 0x1bd   : > { %3695 = vmatprep.subr.mxu1 %v3927_v12  ;;  %3714 = vmatprep.subr.mxu0 %v3927_v12 }
 0x1be   : > { %3696 = vmatpush3.msra.mxu1 %v3249_v42  ;;  %3715 = vmatpush3.msra.mxu0 %v3257_v43  ;;  %v3307_v42 = vld [vmem:[%s4329_s24 + $0x9] ss:$0 sm:$0xff] }
 0x1bf   : > { %3697 = vmatprep.subr.mxu1 %v3927_v12  ;;  %3716 = vmatprep.subr.mxu0 %v3927_v12 }
 0x1c0   : > { %3698 = vmatpush3.msra.mxu1 %v3248_v45  ;;  %3717 = vmatpush3.msra.mxu0 %v3256_v47 }
 0x1c1   : > { %3699 = vmatprep.subr.mxu1 %v3927_v12  ;;  %3718 = vmatprep.subr.mxu0 %v3927_v12 }
 0x1c2   : > { %3700 = vmatpush3.msra.mxu1 %v3247_v48  ;;  %3719 = vmatpush3.msra.mxu0 %v3255_v49 }
 0x1c3   : > { %3701 = vmatprep.subr.mxu1 %v3927_v12  ;;  %3720 = vmatprep.subr.mxu0 %v3927_v12 }
 0x1c4   : > { %3702 = vmatpush3.msra.mxu1 %v3246_v50  ;;  %3721 = vmatpush3.msra.mxu0 %v3254_v51 }
 0x1c5   : > { %3703 = vmatprep.subr.mxu1 %v3927_v12  ;;  %3722 = vmatprep.subr.mxu0 %v3927_v12 }
 0x1c6   : > { %3704 = vmatpush3.msra.mxu1 %v3245_v52  ;;  %3723 = vmatpush3.msra.mxu0 %v3253_v53  ;;  %v4263_v56 = vpop.f32.mrf.mxu1 }
 0x1c7   : > { %3705 = vmatprep.subr.mxu1 %v3927_v12  ;;  %3724 = vmatprep.subr.mxu0 %v3927_v12  ;;  %v1096_v8 = vadd.f32 %v3292_v33, %v4263_v56 }
 0x1c8   : > { %3706 = vmatpush3.msra.mxu1 %v3244_v54  ;;  %3725 = vmatpush3.msra.mxu0 %v3252_v55  ;;  %v3597_v59 = vpop.f32.mrf.mxu1  ;;  %v3314_v54 = vld [vmem:[%s490_s27] ss:$0 sm:$0xff] }
 0x1c9   : > { %3707 = vmatprep.subr.mxu1 %v3927_v12  ;;  %3726 = vmatprep.subr.mxu0 %v3927_v12 }
 0x1ca   : > { %3708 = vmatpush3.msra.mxu1 %v3243_v57  ;;  %3709 = vmatprep.mubr.msk.f32.mxu1 %vm3928_vm2, %v3927_v12 }
 0x1cb   : > { %3727 = vmatpush3.msra.mxu0 %v3251_v58  ;;  %3728 = vmatprep.mubr.msk.f32.mxu0 %vm3928_vm2, %v3927_v12 }
 0x1cc   : > { %3710 = vmatmul.mubr.msk.f32.vlgmr.msra.gmra.mxu1 %vm677_vm0, %v4191_v19  ;;  %3729 = vmatmul.mubr.msk.f32.vlgmr.msra.gmra.mxu0 %vm677_vm0, %v4191_v19 }
 0x1cd   : > { %3731 = vmatprep.subr.mxu1 %v3927_v12  ;;  %3750 = vmatprep.subr.mxu0 %v3927_v12 }
 0x1ce   : > { %3732 = vmatpush3.msra.mxu1 %v3266_v60  ;;  %3751 = vmatpush3.msra.mxu0 %v3274_v61 }
 0x1cf   : > { %3733 = vmatprep.subr.mxu1 %v3927_v12  ;;  %3752 = vmatprep.subr.mxu0 %v3927_v12 }
 0x1d0   : > { %3734 = vmatpush3.msra.mxu1 %v3265_v62  ;;  %3753 = vmatpush3.msra.mxu0 %v3273_v63 }
 0x1d1   : > { %3735 = vmatprep.subr.mxu1 %v3927_v12  ;;  %3754 = vmatprep.subr.mxu0 %v3927_v12 }
 0x1d2   : > { %3736 = vmatpush3.msra.mxu1 %v3264_v0  ;;  %3755 = vmatpush3.msra.mxu0 %v3272_v1 }
 0x1d3   : > { %3737 = vmatprep.subr.mxu1 %v3927_v12  ;;  %3756 = vmatprep.subr.mxu0 %v3927_v12 }
 0x1d4   : > { %3738 = vmatpush3.msra.mxu1 %v3263_v2  ;;  %3757 = vmatpush3.msra.mxu0 %v3271_v3 }
 0x1d5   : > { %3739 = vmatprep.subr.mxu1 %v3927_v12  ;;  %3758 = vmatprep.subr.mxu0 %v3927_v12 }
 0x1d6   : > { %3740 = vmatpush3.msra.mxu1 %v3262_v4  ;;  %3759 = vmatpush3.msra.mxu0 %v3270_v5 }
 0x1d7   : > { %3741 = vmatprep.subr.mxu1 %v3927_v12  ;;  %3760 = vmatprep.subr.mxu0 %v3927_v12 }
 0x1d8   : > { %3742 = vmatpush3.msra.mxu1 %v3261_v6  ;;  %3761 = vmatpush3.msra.mxu0 %v3269_v7 }
 0x1d9   : > { %3743 = vmatprep.subr.mxu1 %v3927_v12  ;;  %3762 = vmatprep.subr.mxu0 %v3927_v12 }
 0x1da   : > { %3744 = vmatpush3.msra.mxu1 %v3260_v9  ;;  %3763 = vmatpush3.msra.mxu0 %v3268_v14 }
 0x1db   : > { %3745 = vmatprep.subr.mxu1 %v3927_v12  ;;  %3764 = vmatprep.subr.mxu0 %v3927_v12 }
 0x1dc   : > { %3746 = vmatpush3.msra.mxu1 %v3259_v15  ;;  %3747 = vmatprep.mubr.msk.f32.mxu1 %vm3928_vm2, %v3927_v12 }
 0x1dd   : > { %3765 = vmatpush3.msra.mxu0 %v3267_v16  ;;  %3766 = vmatprep.mubr.msk.f32.mxu0 %vm3928_vm2, %v3927_v12 }
 0x1de   : > { %3748 = vmatmul.mubr.msk.f32.vlgmr.msra.gmra.mxu1 %vm677_vm0, %v4191_v19  ;;  %3767 = vmatmul.mubr.msk.f32.vlgmr.msra.gmra.mxu0 %vm677_vm0, %v4191_v19 }
 0x1df   : > { %3769 = vmatprep.subr.mxu1 %v3927_v12  ;;  %3771 = vmatprep.mubr.msk.f32.mxu1 %vm3928_vm2, %v3927_v12 }
 0x1e0   : > { %3784 = vmatprep.subr.mxu0 %v3927_v12  ;;  %3786 = vmatprep.mubr.msk.f32.mxu0 %vm3928_vm2, %v3927_v12 }
 0x269   : > { %v1262_v18 = vpop.f32.mrf.mxu1  ;;  %v1332_v19 = vpop.f32.mrf.mxu0 }
 0x26a   : > { %v1263_v21 = vadd.f32 %v3298_v17, %v1262_v18  ;;  %v1333_v27 = vadd.f32 %v3299_v22, %v1332_v19 }
 0x26b   : > { %v3635_v23 = vpop.f32.mrf.mxu1  ;;  %v3654_v24 = vpop.f32.mrf.mxu0 }
 0x26c   : > { %3770 = vmatpush3.xpose.msk.msra.mxu1 %vm782_vm3, %v1263_v21 }
 0x26d   : > { %3774 = vmatprep.subr.mxu1 %v3927_v12 }
 0x26f   : > { %3772 = vmatmul.mubr.msk.f32.vlgmr.msra.gmra.mxu1 %vm782_vm3, %v956_v25 }
 0x270   : > { %3775 = vmatpush3.xpose.msk.msra.mxu1 %vm782_vm3, %v1333_v27  ;;  %3776 = vmatprep.mubr.msk.f32.mxu1 %vm3928_vm2, %v3927_v12 }
 0x271   : > { %3779 = vmatprep.subr.mxu1 %v3927_v12 }
 0x273   : > { %3777 = vmatmul.mubr.msk.f32.vlgmr.msra.gmra.mxu1 %vm782_vm3, %v1026_v28 }
 0x274   : > { %3781 = vmatprep.mubr.msk.f32.mxu1 %vm3928_vm2, %v3927_v12 }
 0x27a   : > { %v1402_v31 = vpop.f32.mrf.mxu1  ;;  %v1472_v32 = vpop.f32.mrf.mxu0 }
 0x27b   : > { %v1403_v35 = vadd.f32 %v3300_v29, %v1402_v31  ;;  %v1473_v36 = vadd.f32 %v3301_v30, %v1472_v32 }
 0x27c   : > { %v3673_v37 = vpop.f32.mrf.mxu1  ;;  %v3692_v38 = vpop.f32.mrf.mxu0 }
 0x27d   : > { %3780 = vmatpush3.xpose.msk.msra.mxu1 %vm782_vm3, %v1403_v35  ;;  %3785 = vmatpush3.xpose.msk.msra.mxu0 %vm782_vm3, %v1473_v36  ;;  %v3309_v38 = vld [vmem:[%s4329_s24 + $0xb] ss:$0 sm:$0xff] }
 0x27e   : > { %3789 = vmatprep.subr.mxu1 %v3927_v12  ;;  %3794 = vmatprep.subr.mxu0 %v3927_v12 }
 0x280   : > { %3782 = vmatmul.mubr.msk.f32.vlgmr.msra.gmra.mxu1 %vm782_vm3, %v1096_v8  ;;  %3787 = vmatmul.mubr.msk.f32.vlgmr.msra.gmra.mxu0 %vm782_vm3, %v1166_v39 }
 0x281   : > { %3791 = vmatprep.mubr.msk.f32.mxu1 %vm3928_vm2, %v3927_v12  ;;  %3796 = vmatprep.mubr.msk.f32.mxu0 %vm3928_vm2, %v3927_v12 }
 0x28c   : > { %v1566_v43 = vpop.f32.mrf.mxu1  ;;  %v1636_v45 = vpop.f32.mrf.mxu0 }
 0x28d   : > { %v1567_v13 = vadd.f32 %v3306_v40, %v1566_v43  ;;  %v1637_v47 = vadd.f32 %v3307_v42, %v1636_v45 }
 0x28e   : > { %v3711_v48 = vpop.f32.mrf.mxu1  ;;  %v3730_v49 = vpop.f32.mrf.mxu0 }
 0x28f   : > { %3790 = vmatpush3.msra.mxu1 %v1567_v13  ;;  %3795 = vmatpush3.msra.mxu0 %v1637_v47  ;;  %v666_v49 = vld [vmem:[%s4396_s11 + $0x8] sm:$0xff] }
 0x290   : > { %3799 = vmatprep.subr.mxu1 %v3927_v12  ;;  %3804 = vmatprep.subr.mxu0 %v3927_v12 }
 0x29e   : > { %v1706_v50 = vpop.f32.mrf.mxu1  ;;  %v4367_v51 = vpop.f32.mrf.mxu0 }
 0x29f   : > { %v1707_v37 = vadd.f32 %v3308_v34, %v1706_v50  ;;  %v1777_v43 = vadd.f32 %v3309_v38, %v4367_v51  ;;  %v665_v50 = vld [vmem:[%s4396_s11] sm:$0xff]  ;;  %v668_v51 = vld [vmem:[%s4396_s11 + $0x18] sm:$0xff]  ;;  %v3197_v34 = vld [vmem:[%s4006_s22 + $0x50] sm:$0xff] }
 0x2a0   : > { %v3749_v52 = vpop.f32.mrf.mxu1  ;;  %v3768_v53 = vpop.f32.mrf.mxu0 }
 0x2a1   : > { %v667_v52 = vld [vmem:[%s4396_s11 + $0x10] sm:$0xff]  ;;  %v3929_v53 = vmov 0  }
 0x2a2   : > { %3894 = vset.pattern.permute.xlu1 %v3929_v53  ;;  %3895 = vset.pattern.permute.xlu0 %v3929_v53  ;;  %v3207_v53 = vld [vmem:[%s4006_s22 + $0xa0] sm:$0xff] }
 0x32f   : > { %v1858_v55 = vpop.f32.mrf.mxu1 }
 0x330   : > { %v1859_v56 = vadd.f32 %v3314_v54, %v1858_v55  ;;  %v523_v55 = vld [vmem:[%s484_s15 + $0x8] sm:$0xff] }
 0x331   : > { %v3773_v57 = vpop.f32.mrf.mxu1 }
 0x332   : > { %v2091_v58 = vsel %vm2090_vm4, %v1859_v56, -inf }
 0x333   : > { %2092 = vmax.xlane.f32.xlu0 %v2091_v58  ;;  %v1934_v59 = vpop.f32.mrf.mxu1  ;;  %v669_v58 = vld [vmem:[%s4396_s11 + $0x20] sm:$0xff] }
 0x334   : > { %v1935_v60 = vadd.f32 %v3314_v54, %v1934_v59 }
 0x335   : > { %v3778_v61 = vpop.f32.mrf.mxu1 }
 0x336   : > { %v2094_v62 = vsel %vm2090_vm4, %v1935_v60, -inf }
 0x337   : > { %2095 = vmax.xlane.f32.xlu1 %v2094_v62  ;;  %v671_v62 = vld [vmem:[%s4396_s11 + $0x30] sm:$0xff] }
 0x340   : > { %v2010_v63 = vpop.f32.mrf.mxu1  ;;  %v2086_v0 = vpop.f32.mrf.mxu0 }
 0x341   : > { %v2011_v1 = vadd.f32 %v3314_v54, %v2010_v63  ;;  %v2087_v2 = vadd.f32 %v3314_v54, %v2086_v0  ;;  %v522_v54 = vld [vmem:[%s484_s15] sm:$0xff] }
 0x342   : > { %v3783_v3 = vpop.f32.mrf.mxu1  ;;  %v3788_v4 = vpop.f32.mrf.mxu0 }
 0x343   : > { %v2100_v5 = vsel %vm2090_vm4, %v2087_v2, -inf  ;;  %v2097_v6 = vsel %vm2090_vm4, %v2011_v1, -inf  ;;  %v760_v4 = vand.u32 127, %v673_v10 }
 0x344   : > { %2101 = vmax.xlane.f32.xlu0 %v2100_v5  ;;  %2098 = vmax.xlane.f32.xlu1 %v2097_v6 }
 0x3bc   : > { %v2093_v7 = vpop.xlane.xlu0 %2092 }
 0x3bd   : > { %v2103_v9 = vsub.f32 %v1859_v56, %v2093_v7  ;;  %v670_v56 = vld [vmem:[%s4396_s11 + $0x28] sm:$0xff] }
 0x3bf   : > { %v2107_v14 = vmul.f32 1.442695, %v2103_v9 }
 0x3c0   : > { %v2096_v15 = vpop.xlane.xlu1 %2095 }
 0x3c1   : > { %3898 = vpow2.f32 %v2107_v14  ;;  %v2104_v16 = vsub.f32 %v1935_v60, %v2096_v15  ;;  %v672_v60 = vld [vmem:[%s4396_s11 + $0x38] sm:$0xff] }
 0x3c3   : > { %v2109_v17 = vmul.f32 1.442695, %v2104_v16 }
 0x3c5   : > { %3900 = vpow2.f32 %v2109_v17  ;;  %v2728_v17 = vsub.s32 1, %v4020_v11 }
 0x3cd   : > { %v2102_v18 = vpop.xlane.xlu0 %2101  ;;  %v2099_v19 = vpop.xlane.xlu1 %2098 }
 0x3ce   : > { %v3899_v20 = vpop.eup %3898  ;;  %v2106_v21 = vsub.f32 %v2087_v2, %v2102_v18  ;;  %v2105_v22 = vsub.f32 %v2011_v1, %v2099_v19 }
 0x3cf   : > { %v2115_v23 = vsel %vm2090_vm4, %v3899_v20, 0.0 }
 0x3d0   : > { %v2113_v24 = vmul.f32 1.442695, %v2106_v21  ;;  %v2111_v25 = vmul.f32 1.442695, %v2105_v22  ;;  %2116 = vadd.xlane.f32.xlu1 %v2115_v23 }
 0x3d2   : > { %v3901_v26 = vpop.eup %3900  ;;  %3902 = vpow2.f32 %v2113_v24 }
 0x3d3   : > { %3904 = vpow2.f32 %v2111_v25  ;;  %v2118_v27 = vsel %vm2090_vm4, %v3901_v26, 0.0  ;;  %v2729_v25 = vrot.slane %v4114_v41, %v2728_v17  ;;  %v3200_v41 = vld [vmem:[%s4006_s22 + $0x68] sm:$0xff] }
 0x3d4   : > { %2119 = vadd.xlane.f32.xlu0 %v2118_v27 }
 0x3df   : > { %v3903_v28 = vpop.eup %3902 }
 0x3e0   : > { %v3905_v29 = vpop.eup %3904  ;;  %v2124_v30 = vsel %vm2090_vm4, %v3903_v28, 0.0 }
 0x3e1   : > { %2125 = vadd.xlane.f32.xlu0 %v2124_v30  ;;  %v2121_v31 = vsel %vm2090_vm4, %v3905_v29, 0.0 }
 0x3e2   : > { %2122 = vadd.xlane.f32.xlu1 %v2121_v31  ;;  %v3202_v31 = vld [vmem:[%s4006_s22 + $0x78] sm:$0xff] }
 0x3f3   : > { %762 = vperm.xlu1 %3894, %v522_v54   ;;  %v3206_v54 = vld [vmem:[%s4006_s22 + $0x98] sm:$0xff] }
 0x3f7   : > { %765 = vperm.xlu0 %3895, %v523_v55   ;;  %v3205_v55 = vld [vmem:[%s4006_s22 + $0x90] sm:$0xff] }
 0x459   : > { %v2117_v32 = vpop.xlane.xlu1 %2116 }
 0x45a   : > { %3906 = vrcp.f32 %v2117_v32  ;;  %v3201_v32 = vld [vmem:[%s4006_s22 + $0x70] sm:$0xff] }
 0x45d   : > { %v2120_v33 = vpop.xlane.xlu0 %2119 }
 0x45e   : > { %3908 = vrcp.f32 %v2120_v33  ;;  %v3199_v33 = vld [vmem:[%s4006_s22 + $0x60] sm:$0xff] }
 0x467   : > { %v3907_v35 = vpop.eup %3906 }
 0x468   : > { %v2131_v36 = vmul.f32 %v3907_v35, %v3899_v20  ;;  %v3196_v35 = vld [vmem:[%s4006_s22 + $0x48] sm:$0xff] }
 0x46a   : > { %v2126_v8 = vpop.xlane.xlu0 %2125  ;;  %3792 = vmatmul.mubr.msk.f32.vlgmr.msra.gmra.mxu1 %vm2090_vm4, %v2131_v36  ;;  %v3195_v36 = vld [vmem:[%s4006_s22 + $0x40] sm:$0xff] }
 0x46b   : > { %v3909_v39 = vpop.eup %3908  ;;  %3910 = vrcp.f32 %v2126_v8  ;;  %v2123_v40 = vpop.xlane.xlu1 %2122  ;;  %3800 = vmatpush3.msra.mxu1 %v1707_v37  ;;  %3801 = vmatprep.mubr.msk.f32.mxu1 %vm3928_vm2, %v3927_v12 }
 0x46c   : > { %3912 = vrcp.f32 %v2123_v40  ;;  %v2132_v42 = vmul.f32 %v3909_v39, %v3901_v26  ;;  %3809 = vmatprep.subr.mxu1 %v3927_v12 }
 0x46e   : > { %3797 = vmatmul.mubr.msk.f32.vlgmr.msra.gmra.mxu0 %vm2090_vm4, %v2132_v42 }
 0x46f   : > { %3805 = vmatpush3.msra.mxu0 %v1777_v43  ;;  %3806 = vmatprep.mubr.msk.f32.mxu0 %vm3928_vm2, %v3927_v12  ;;  %v763_v5 = vpop.permute.xlu1 %762 }
 0x470   : > { %3816 = vmatprep.subr.mxu0 %v3927_v12  ;;  %vm767_vm5 = vcmp.eq.s32.totalorder %v763_v5, %v760_v4 }
 0x471   : > { %v3285_v6 = vsel %vm767_vm5, 1.0, %v3927_v12 }
 0x472   : > { %v766_v23 = vpop.permute.xlu0 %765 }
 0x473   : > { %vm768_vm6 = vcmp.eq.s32.totalorder %v766_v23, %v760_v4 }
 0x474   : > { %v3286_v30 = vsel %vm768_vm6, 1.0, %v3927_v12 }
 0x478   : > { %v3911_v45 = vpop.eup %3910 }
 0x479   : > { %v3913_v13 = vpop.eup %3912  ;;  %v2134_v47 = vmul.f32 %v3911_v45, %v3903_v28 }
 0x47a   : > { %v2133_v48 = vmul.f32 %v3913_v13, %v3905_v29 }
 0x47b   : > { %3807 = vmatmul.mubr.msk.f32.vlgmr.msra.gmra.mxu0 %vm2090_vm4, %v2134_v47 }
 0x47c   : > { %3802 = vmatmul.mubr.msk.f32.vlgmr.msra.gmra.mxu1 %vm2090_vm4, %v2133_v48  ;;  %3820 = vmatprep.mubr.msk.f32.mxu0 %vm3928_vm2, %v3927_v12 }
 0x47d   : > { %3810 = vmatpush3.msra.mxu1 %v666_v49  ;;  %3813 = vmatprep.mubr.msk.f32.mxu1 %vm3928_vm2, %v3927_v12 }
 0x47e   : > { %3811 = vmatprep.subr.mxu1 %v3927_v12  ;;  %3817 = vmatpush3.msra.mxu0 %v668_v51  ;;  %v3209_v51 = vld [vmem:[%s4006_s22 + $0xb0] sm:$0xff] }
 0x47f   : > { %3812 = vmatpush3.msra.mxu1 %v665_v50  ;;  %3818 = vmatprep.subr.mxu0 %v3927_v12  ;;  %v3210_v50 = vld [vmem:[%s4006_s22 + $0xb8] sm:$0xff] }
 0x480   : > { %3823 = vmatprep.subr.mxu1 %v3927_v12  ;;  %3819 = vmatpush3.msra.mxu0 %v667_v52  ;;  %v3208_v52 = vld [vmem:[%s4006_s22 + $0xa8] sm:$0xff] }
 0x481   : > { %3830 = vmatprep.subr.mxu0 %v3927_v12 }
 0x52a   : > { %v2204_v57 = vpop.f32.mrf.mxu1 }
 0x52b   : > { %3814 = vmatmul.mubr.msk.f32.vlgmr.msra.gmra.mxu1 %vm782_vm3, %v2204_v57  ;;  %v3203_v57 = vld [vmem:[%s4006_s22 + $0x80] sm:$0xff] }
 0x52c   : > { %v3793_v59 = vpop.f32.mrf.mxu1  ;;  %3824 = vmatpush3.msra.mxu1 %v670_v56  ;;  %3827 = vmatprep.mubr.msk.f32.mxu1 %vm3928_vm2, %v3927_v12  ;;  %v3204_v56 = vld [vmem:[%s4006_s22 + $0x88] sm:$0xff] }
 0x52d   : > { %3825 = vmatprep.subr.mxu1 %v3927_v12 }
 0x52e   : > { %v2277_v61 = vpop.f32.mrf.mxu0  ;;  %3826 = vmatpush3.msra.mxu1 %v669_v58 }
 0x52f   : > { %3821 = vmatmul.mubr.msk.f32.vlgmr.msra.gmra.mxu0 %vm782_vm3, %v2277_v61 }
 0x530   : > { %v3798_v63 = vpop.f32.mrf.mxu0  ;;  %3831 = vmatpush3.msra.mxu0 %v672_v60  ;;  %3834 = vmatprep.mubr.msk.f32.mxu0 %vm3928_vm2, %v3927_v12 }
 0x531   : > { %3832 = vmatprep.subr.mxu0 %v3927_v12  ;;  %v3198_v12 = vld [vmem:[%s4006_s22 + $0x58] sm:$0xff] }
 0x532   : > { %3833 = vmatpush3.msra.mxu0 %v671_v62 }
 0x533   : > { %3842 = vmatprep.subr.mxu0 %v3210_v50 }
 0x53b   : > { %v2423_v0 = vpop.f32.mrf.mxu0 }
 0x53c   : > { %v2350_v1 = vpop.f32.mrf.mxu1  ;;  %3835 = vmatmul.mubr.msk.f32.vlgmr.msra.gmra.mxu0 %vm782_vm3, %v2423_v0  ;;  %v2841_v0 = vsub.s32 2, %v4020_v11 }
 0x53d   : > { %3828 = vmatmul.mubr.msk.f32.vlgmr.msra.gmra.mxu1 %vm782_vm3, %v2350_v1  ;;  %v3808_v2 = vpop.f32.mrf.mxu0  ;;  %3843 = vmatpush3.msra.mxu0 %v3210_v50  ;;  %v2847_v1 = vsub.s32 3, %v4020_v11 }
 0x53e   : > { %v3803_v3 = vpop.f32.mrf.mxu1  ;;  %3839 = vmatprep.mubr.msk.f32.mxu1 %vm2090_vm4, %v3285_v6  ;;  %3844 = vmatprep.subr.mxu0 %v3209_v51  ;;  %v3918_v2 = vld [vmem:[%s4110_s19] sm:$0x1f] }
 0x53f   : > { %3845 = vmatpush3.msra.mxu0 %v3209_v51  ;;  %v2842_v3 = vrot.slane %v3918_v2, %v2841_v0  ;;  %v2848_v6 = vrot.slane %v3918_v2, %v2847_v1 }
 0x540   : > { %3846 = vmatprep.subr.mxu0 %v3208_v52 }
 0x541   : > { %3847 = vmatpush3.msra.mxu0 %v3208_v52 }
 0x542   : > { %3848 = vmatprep.subr.mxu0 %v3207_v53 }
 0x543   : > { %3849 = vmatpush3.msra.mxu0 %v3207_v53 }
 0x544   : > { %3850 = vmatprep.subr.mxu0 %v3206_v54 }
 0x545   : > { %3851 = vmatpush3.msra.mxu0 %v3206_v54 }
 0x546   : > { %3852 = vmatprep.subr.mxu0 %v3205_v55 }
 0x547   : > { %3853 = vmatpush3.msra.mxu0 %v3205_v55 }
 0x548   : > { %3854 = vmatprep.subr.mxu0 %v3204_v56 }
 0x549   : > { %3855 = vmatpush3.msra.mxu0 %v3204_v56 }
 0x54a   : > { %3856 = vmatprep.subr.mxu0 %v3203_v57 }
 0x54b   : > { %3857 = vmatpush3.msra.mxu0 %v3203_v57 }
 0x5eb   : > { %v2496_v7 = vpop.f32.mrf.mxu1 }
 0x5ec   : > { %v2719_v18 = vsel %vm677_vm0, %v2496_v7, 0.0 }
 0x5ed   : > { %v3815_v9 = vpop.f32.mrf.mxu1 }
 0x5ef   : > { %v2569_v14 = vpop.f32.mrf.mxu0 }
 0x5f0   : > { %v2720_v16 = vsel %vm677_vm0, %v2569_v14, 0.0 }
 0x5f1   : > { %v3822_v15 = vpop.f32.mrf.mxu0  ;;  %v2721_v20 = vadd.f32 %v2720_v16, %v2719_v18  ;;  %v3015_v18 = vsub.s32 4, %v4020_v11 }
 0x5fc   : > { %v2715_v19 = vpop.f32.mrf.mxu0 }
 0x5fd   : > { %v2642_v10 = vpop.f32.mrf.mxu1  ;;  %v2724_v27 = vsel %vm677_vm0, %v2715_v19, 0.0 }
 0x5fe   : > { %v2722_v21 = vsel %vm677_vm0, %v2642_v10, 0.0  ;;  %v3836_v22 = vpop.f32.mrf.mxu0 }
 0x5ff   : > { %v2723_v24 = vadd.f32 %v2722_v21, %v2721_v20  ;;  %v3829_v26 = vpop.f32.mrf.mxu1  ;;  %v3016_v20 = vrot.slane %v3918_v2, %v3015_v18 }
 0x601   : > { %v2725_v28 = vadd.f32 %v2724_v27, %v2723_v24 }
 0x603   : > { %v2730_v29 = vadd.f32 %v2729_v25, %v2725_v28 }
 0x605   : > { %3837 = vmatprep.subr.mxu1 %v2730_v29 }
 0x606   : > { %3838 = vmatpush3.msra.mxu1 %v2730_v29 }
 0x607   : > { %3840 = vmatmul.mubr.msk.f32.vlgmr.msra.gmra.mxu1 %vm2090_vm4, %v3286_v30  ;;  %3861 = vmatprep.subr.mxu1 %v3202_v31 }
 0x608   : > { %3862 = vmatpush3.msra.mxu1 %v3202_v31  ;;  %3877 = vmatprep.mubr.msk.f32.mxu1 %vm677_vm0, %v4119_v46 }
 0x609   : > { %3863 = vmatprep.subr.mxu1 %v3201_v32 }
 0x60a   : > { %3864 = vmatpush3.msra.mxu1 %v3201_v32 }
 0x60b   : > { %3865 = vmatprep.subr.mxu1 %v3200_v41 }
 0x60c   : > { %3866 = vmatpush3.msra.mxu1 %v3200_v41 }
 0x60d   : > { %3867 = vmatprep.subr.mxu1 %v3199_v33 }
 0x60e   : > { %3868 = vmatpush3.msra.mxu1 %v3199_v33 }
 0x60f   : > { %3869 = vmatprep.subr.mxu1 %v3198_v12 }
 0x610   : > { %3870 = vmatpush3.msra.mxu1 %v3198_v12 }
 0x611   : > { %3871 = vmatprep.subr.mxu1 %v3197_v34 }
 0x612   : > { %3872 = vmatpush3.msra.mxu1 %v3197_v34 }
 0x613   : > { %3873 = vmatprep.subr.mxu1 %v3196_v35 }
 0x614   : > { %3874 = vmatpush3.msra.mxu1 %v3196_v35 }
 0x615   : > { %3875 = vmatprep.subr.mxu1 %v3195_v36 }
 0x616   : > { %3876 = vmatpush3.msra.mxu1 %v3195_v36 }
 0x617   : > { %3878 = vmatmul.mubr.msk.f32.vlgmr.msra.gmra.mxu1 %vm677_vm0, %v4117_v44 }
 0x6c7   : > { %v3841_v46 = vpop.f32.mrf.mxu1 }
 0x6c8   : > { %v2815_v37 = vsel %vm677_vm0, %v3841_v46, 0.0 }
 0x6c9   : > { %2816 = vadd.xlane.f32.xlu0 %v2815_v37  ;;  %v2803_v38 = vpop.f32.mrf.mxu1 }
 0x6ca   : > { %v2812_v8 = vsel %vm677_vm0, %v2803_v38, 0.0 }
 0x6cb   : > { %2813 = vadd.xlane.f32.xlu1 %v2812_v8 }
 0x6d7   : > { %v3879_v19 = vpop.f32.mrf.mxu1 }
 0x6d9   : > { %v3004_v22 = vpop.f32.mrf.mxu1 }
 0x752   : > { %v2817_v39 = vpop.xlane.xlu0 %2816 }
 0x753   : > { %v2820_v40 = vmul.f32 0.015625, %v2817_v39 }
 0x754   : > { %v2814_v42 = vpop.xlane.xlu1 %2813 }
 0x755   : > { %v2819_v43 = vmul.f32 0.015625, %v2814_v42  ;;  %v2822_v45 = vsub.f32 %v3841_v46, %v2820_v40 }
 0x757   : > { %v2821_v13 = vsub.f32 %v2803_v38, %v2819_v43  ;;  %v2824_v48 = vmul.f32 %v2822_v45, %v2822_v45 }
 0x759   : > { %v2823_v47 = vmul.f32 %v2821_v13, %v2821_v13  ;;  %v2828_v49 = vsel %vm677_vm0, %v2824_v48, 0.0 }
 0x75b   : > { %v2825_v44 = vsel %vm677_vm0, %v2823_v47, 0.0 }
 0x75c   : > { %2826 = vadd.xlane.f32.xlu1 %v2825_v44 }
 0x760   : > { %2829 = vadd.xlane.f32.xlu1 %v2828_v49 }
 0x7e5   : > { %v2827_v58 = vpop.xlane.xlu1 %2826 }
 0x7e6   : > { %v2831_v59 = vmul.f32 0.015625, %v2827_v58 }
 0x7e8   : > { %v2833_v60 = vadd.f32 1e-05, %v2831_v59 }
 0x7e9   : > { %v2830_v61 = vpop.xlane.xlu1 %2829 }
 0x7ea   : > { %3914 = vrsqrt.f32 %v2833_v60  ;;  %v2832_v62 = vmul.f32 0.015625, %v2830_v61 }
 0x7ec   : > { %v2834_v63 = vadd.f32 1e-05, %v2832_v62 }
 0x7ee   : > { %3916 = vrsqrt.f32 %v2834_v63 }
 0x7f7   : > { %v3915_v4 = vpop.eup %3914 }
 0x7f8   : > { %v2837_v5 = vmul.f32 %v3915_v4, %v2821_v13 }
 0x7fa   : > { %v2843_v7 = vmul.f32 %v2842_v3, %v2837_v5 }
 0x7fb   : > { %v3917_v9 = vpop.eup %3916 }
 0x7fc   : > { %v2838_v14 = vmul.f32 %v3917_v9, %v2822_v45  ;;  %v2849_v15 = vadd.f32 %v2848_v6, %v2843_v7 }
 0x7fe   : > { %v2844_v16 = vmul.f32 %v2842_v3, %v2838_v14  ;;  %3858 = vmatprep.mubr.msk.f32.mxu0 %vm677_vm0, %v2849_v15 }
 0x800   : > { %v2850_v17 = vadd.f32 %v2848_v6, %v2844_v16 }
 0x802   : > { %3859 = vmatmul.mubr.msk.f32.vlgmr.msra.gmra.mxu0 %vm677_vm0, %v2850_v17 }
 0x8c2   : > { %v3860_v10 = vpop.f32.mrf.mxu0 }
 0x8c3   : > { %v3010_v21 = vadd.f32 %v3879_v19, %v3860_v10 }
 0x8c4   : > { %v2923_v23 = vpop.f32.mrf.mxu0 }
 0x8c5   : > { %v3018_v24 = vadd.f32 %v3016_v20, %v3010_v21  ;;  %v3005_v25 = vadd.f32 %v3004_v22, %v2923_v23 }
 0x8c7   : > { %3020 = vst.msk [vmem:[%s518_s18 + $0x8] sm:$0xff] %vm677_vm0, %v3018_v24  ;;  %v3017_v26 = vadd.f32 %v3016_v20, %v3005_v25 }
 0x8c9   : > { %3019 = vst.msk [vmem:[%s518_s18] sm:$0xff] %vm677_vm0, %v3017_v26 }
 0x8ca PF: > { %s20_s13 = sadd.s32 1, %s3925_s13  }
 0x8cb   : > { %p17_p4 = scmp.ge.s32.totalorder %s20_s13, 4  }
 0x8cd   :  { %19 = sbr.rel (!%p17_p4) target bundleno = 1 (0x1), region = 123 }

</bundles_post_ra>
